<compile_context>
chip_gen: v7x
topology: tpu7x:2x2x1
jax: 0.10.0
libtpu: 0.0.40
codegen_flags: <defaults>
</compile_context>

<pallas_src>
import math

import jax
import jax.numpy as jnp
from jax.experimental import pallas as pl
from jax.experimental.pallas import tpu as pltpu

C_PAD = 128                      # feature dims padded to one lane-dense vreg width
TILE_M = 128                     # node-row tile; bump to 256 on v5e/v6e for big graphs
VMEM_LIMIT_BYTES = 48 * 1024 * 1024  # safe on v7x (64 MiB physical); raise to ~100 MiB on v5e/v6e


def _round_up(x, m):
    return ((x + m - 1) // m) * m


# ----------------------------------------------------------------------------- kernel


def make_conv_kernel(apply_relu_out: bool, c_pad: int = C_PAD):
    """One LASAGESConv layer (mean aggregation + gated neighbor transform + self path)."""

    def kernel(a_ref, invd_ref, xfull_ref, xrows_ref, wn_ref, bn_ref, ws_ref, bs_ref, o_ref):
        # mean aggregation: (int8 counts @ X) * exact f32 inv-degree.
        # int8 -> f32 -> bf16 upcast for portable lowering on v5e/v6e/v7x (VPU has slack here).
        a_bf = a_ref[...].astype(jnp.float32).astype(jnp.bfloat16)           # [tm, n_pad] bf16
        agg = jnp.dot(a_bf, xfull_ref[...],
                      preferred_element_type=jnp.float32)                    # [tm, c_pad] f32
        agg = agg * invd_ref[...]                                            # exact mean scaling

        # fc_neigh_fraud | fc_neigh_benign as ONE lane-dense matmul -> [tm, 2*c_pad]
        frbe = jnp.dot(agg.astype(jnp.bfloat16), wn_ref[...],
                       preferred_element_type=jnp.float32) + bn_ref[...]
        # fc_self | fc_balance folded into ONE x-side matmul (balance logit = column c_pad)
        selfbal = jnp.dot(xrows_ref[...], ws_ref[...],
                          preferred_element_type=jnp.float32) + bs_ref[...]

        fr = frbe[:, :c_pad]
        be = frbe[:, c_pad:]
        h_self = selfbal[:, :c_pad]
        bal = jax.nn.sigmoid(selfbal[:, c_pad:c_pad + 1])                    # [tm, 1] f32

        # update(): relu(fr*bal + be*(1-bal)) == relu(be + bal*(fr - be))
        out = h_self + jnp.maximum(be + bal * (fr - be), 0.0)
        if apply_relu_out:                                                   # trailing F.relu (non-last layer)
            out = jnp.maximum(out, 0.0)
        o_ref[...] = out.astype(o_ref.dtype)                                 # bf16 store (lane-dense)

    return kernel


def lasage_conv(a_i8, invd, x_pad, wn, bn, ws, bs, *, apply_relu_out,
                tile_m=TILE_M, vmem_limit_bytes=VMEM_LIMIT_BYTES):
    """One LASAGESConv layer as a single pallas_call; grid over node-row tiles ("parallel")."""
    n_pad = x_pad.shape[0]
    assert n_pad % tile_m == 0
    grid = (n_pad // tile_m,)

    return pl.pallas_call(
        make_conv_kernel(apply_relu_out, C_PAD),
        out_shape=jax.ShapeDtypeStruct((n_pad, C_PAD), jnp.bfloat16),
        grid_spec=pltpu.PrefetchScalarGridSpec(
            num_scalar_prefetch=0,
            grid=grid,
            in_specs=[
                pl.BlockSpec((tile_m, n_pad), lambda i: (i, 0)),         # int8 neighbor-count row tile
                pl.BlockSpec((tile_m, 1), lambda i: (i, 0)),             # f32 inv-degree row tile
                pl.BlockSpec((n_pad, C_PAD), lambda i: (0, 0)),          # X, full resident (agg side)
                pl.BlockSpec((tile_m, C_PAD), lambda i: (i, 0)),         # X row tile (self/balance side)
                pl.BlockSpec((C_PAD, 2 * C_PAD), lambda i: (0, 0)),      # W_fr | W_be
                pl.BlockSpec((1, 2 * C_PAD), lambda i: (0, 0)),          # b_fr | b_be
                pl.BlockSpec((C_PAD, 2 * C_PAD), lambda i: (0, 0)),      # W_self | w_bal
                pl.BlockSpec((1, 2 * C_PAD), lambda i: (0, 0)),          # b_self | b_bal
            ],
            out_specs=pl.BlockSpec((tile_m, C_PAD), lambda i: (i, 0)),
        ),
        compiler_params=pltpu.CompilerParams(
            # disjoint output row tiles -> safe to shard across v7x's 2 TensorCores
            dimension_semantics=("parallel",),
            vmem_limit_bytes=vmem_limit_bytes,
        ),
    )(a_i8, invd, x_pad, x_pad, wn, bn, ws, bs)


# ----------------------------------------------------------------------------- host-side packing


def pack_layer_weights(p, c_pad=C_PAD):
    """Concatenate (fraud|benign) and (self|balance) into two lane-dense [C_PAD, 2*C_PAD] mats."""
    cin, cout = p["w_self"].shape
    wn = jnp.zeros((c_pad, 2 * c_pad), jnp.float32)
    wn = wn.at[:cin, :cout].set(p["w_fr"]).at[:cin, c_pad:c_pad + cout].set(p["w_be"])
    bn = jnp.zeros((1, 2 * c_pad), jnp.float32)
    bn = bn.at[:, :cout].set(p["b_fr"]).at[:, c_pad:c_pad + cout].set(p["b_be"])
    ws = jnp.zeros((c_pad, 2 * c_pad), jnp.float32)
    ws = ws.at[:cin, :cout].set(p["w_self"]).at[:cin, c_pad:c_pad + 1].set(p["w_bal"])
    bs = jnp.zeros((1, 2 * c_pad), jnp.float32)
    bs = bs.at[:, :cout].set(p["b_self"]).at[:, c_pad:c_pad + 1].set(p["b_bal"])
    return wn.astype(jnp.bfloat16), bn, ws.astype(jnp.bfloat16), bs


def lasage_s_forward(x, a_counts, inv_deg, params, *, tile_m=TILE_M):
    """Returns (x32, out) matching LASAGE_S.forward in eval mode with batch=None.

    NOTE: the reference computes initial_x = self.linear1(x) but never uses it — dead code,
    omitted here (XLA would DCE it anyway).  Dropout is identity in eval mode.
    """
    n, in_ch = x.shape
    hid = params["layer0"]["w_self"].shape[1]
    cout = params["layer1"]["w_self"].shape[1]
    n_pad = _round_up(n, tile_m)

    # int8 neighbor counts + f32 inv-degree: exact mean, half the HBM bytes of a bf16 A_norm.
    # (assumes < 128 parallel edges per (i, j) pair so counts fit int8)
    a_i8 = jnp.zeros((n_pad, n_pad), jnp.int8).at[:n, :n].set(a_counts.astype(jnp.int8))
    invd = jnp.zeros((n_pad, 1), jnp.float32).at[:n, :].set(inv_deg)       # 0 on padded rows
    x_pad = jnp.zeros((n_pad, C_PAD), jnp.bfloat16).at[:n, :in_ch].set(x.astype(jnp.bfloat16))

    wn0, bn0, ws0, bs0 = pack_layer_weights(params["layer0"])
    wn1, bn1, ws1, bs1 = pack_layer_weights(params["layer1"])

    # layer 0 (+ trailing relu): bf16 output doubles as x32 and as layer-1 MXU feed.
    h_pad = lasage_conv(a_i8, invd, x_pad, wn0, bn0, ws0, bs0,
                        apply_relu_out=True, tile_m=tile_m)
    # layer 1 (no trailing relu).
    y_pad = lasage_conv(a_i8, invd, h_pad, wn1, bn1, ws1, bs1,
                        apply_relu_out=False, tile_m=tile_m)

    x32 = h_pad[:n, :hid].astype(jnp.float32)
    y = y_pad[:n, :cout].astype(jnp.float32)
    return x32, y


# ----------------------------------------------------------------------------- params / graph / reference


def linear_params(key, fan_in, fan_out):
    """PyTorch nn.Linear default init (uniform ±1/sqrt(fan_in)); weight stored transposed [in, out]."""
    kw, kb = jax.random.split(key)
    bound = 1.0 / math.sqrt(fan_in)
    w = jax.random.uniform(kw, (fan_in, fan_out), jnp.float32, -bound, bound)
    b = jax.random.uniform(kb, (1, fan_out), jnp.float32, -bound, bound)
    return w, b


def make_layer_params(key, cin, cout):
    k = jax.random.split(key, 4)
    w_fr, b_fr = linear_params(k[0], cin, cout)      # fc_neigh_fraud
    w_be, b_be = linear_params(k[1], cin, cout)      # fc_neigh_benign
    w_bal, b_bal = linear_params(k[2], cin, 1)       # fc_balance
    w_self, b_self = linear_params(k[3], cin, cout)  # fc_self
    return dict(w_fr=w_fr, b_fr=b_fr, w_be=w_be, b_be=b_be,
                w_bal=w_bal, b_bal=b_bal, w_self=w_self, b_self=b_self)


def build_graph_operators(edge_index, num_nodes):
    """Dense neighbor-count matrix + inv-degree matching PyG mean aggregation with add_self_loops.

    Matches PyG defaults: edge multiplicity (incl. pre-existing self loops) is counted, and one
    self loop per node is appended on top, exactly like add_self_loops + scatter-mean.
    """
    src, dst = edge_index[0], edge_index[1]
    counts = jnp.zeros((num_nodes, num_nodes), jnp.float32)
    counts = counts.at[dst, src].add(1.0)                      # message x_j flows j -> i
    counts = counts + jnp.eye(num_nodes, dtype=jnp.float32)    # add_self_loops
    deg = jnp.sum(counts, axis=1, keepdims=True)
    return counts, 1.0 / deg


def lasage_s_reference(x, a_norm, params):
    """Pure-JAX f32 reference of the original module's forward (eval mode)."""
    def conv(a, xx, p, relu_out):
        agg = a @ xx
        fr = agg @ p["w_fr"] + p["b_fr"]
        be = agg @ p["w_be"] + p["b_be"]
        bal = jax.nn.sigmoid(xx @ p["w_bal"] + p["b_bal"])
        h_self = xx @ p["w_self"] + p["b_self"]
        out = h_self + jnp.maximum(fr * bal + be * (1.0 - bal), 0.0)
        return jnp.maximum(out, 0.0) if relu_out else out

    h = conv(a_norm, x, params["layer0"], True)
    return h, conv(a_norm, h, params["layer1"], False)


# ----------------------------------------------------------------------------- main


if __name__ == "__main__":
    N_NODES = 16
    N_EDGES = 48
    IN_CH, HID_CH, OUT_CH = 8, 32, 8   # HID_CH must be 32 so x32 is defined (as in the reference)

    root = jax.random.PRNGKey(0)
    k_x, k_src, k_dst, k_l0, k_l1 = jax.random.split(root, 5)

    x = jax.random.normal(k_x, (N_NODES, IN_CH), jnp.float32)
    src = jax.random.randint(k_src, (N_EDGES,), 0, N_NODES)
    dst = jax.random.randint(k_dst, (N_EDGES,), 0, N_NODES)
    edge_index = jnp.stack([src, dst], axis=0)

    a_counts, inv_deg = build_graph_operators(edge_index, N_NODES)

    params = dict(
        layer0=make_layer_params(k_l0, IN_CH, HID_CH),
        layer1=make_layer_params(k_l1, HID_CH, OUT_CH),
    )

    x32, out = jax.jit(lasage_s_forward)(x, a_counts, inv_deg, params)
    jax.block_until_ready((x32, out))

    assert x32.shape == (N_NODES, HID_CH)
    assert out.shape == (N_NODES, OUT_CH)

    # correctness vs pure-JAX f32 reference (bf16 MXU feed / bf16 h handoff -> loose tolerance)
    x32_ref, out_ref = lasage_s_reference(x, a_counts * inv_deg, params)
    assert jnp.allclose(x32, x32_ref, atol=1e-1, rtol=1e-1), float(jnp.max(jnp.abs(x32 - x32_ref)))
    assert jnp.allclose(out, out_ref, atol=1e-1, rtol=1e-1), float(jnp.max(jnp.abs(out - out_ref)))

    print("KERNEL_OK")
</pallas_src>

<mosaic_0001>
module attributes {stable_mosaic.version = 11 : i64} {
  func.func @kernel(%arg0: i32, %arg1: memref<128x128xi8, #tpu.memory_space<vmem>>, %arg2: memref<128x1xf32, #tpu.memory_space<vmem>>, %arg3: memref<128x128xbf16, #tpu.memory_space<vmem>>, %arg4: memref<128x128xbf16, #tpu.memory_space<vmem>>, %arg5: memref<128x256xbf16, #tpu.memory_space<vmem>>, %arg6: memref<1x256xf32, #tpu.memory_space<vmem>>, %arg7: memref<128x256xbf16, #tpu.memory_space<vmem>>, %arg8: memref<1x256xf32, #tpu.memory_space<vmem>>, %arg9: memref<128x128xbf16, #tpu.memory_space<vmem>>) attributes {dimension_semantics = [#tpu.dimension_semantics<parallel>], iteration_bounds = array<i64: 1>, scalar_prefetch = 0 : i64, scratch_operands = 0 : i64, tpu.core_type = #tpu.core_type<tc>, window_params = [{transform_indices = @transform_0, window_bounds = array<i64: 128, 128>}, {transform_indices = @transform_1, window_bounds = array<i64: 128, 1>}, {pipeline_mode = #tpu.pipeline_mode<synchronous>, transform_indices = @transform_2, window_bounds = array<i64: 128, 128>}, {transform_indices = @transform_3, window_bounds = array<i64: 128, 128>}, {pipeline_mode = #tpu.pipeline_mode<synchronous>, transform_indices = @transform_4, window_bounds = array<i64: 128, 256>}, {pipeline_mode = #tpu.pipeline_mode<synchronous>, transform_indices = @transform_5, window_bounds = array<i64: 1, 256>}, {pipeline_mode = #tpu.pipeline_mode<synchronous>, transform_indices = @transform_6, window_bounds = array<i64: 128, 256>}, {pipeline_mode = #tpu.pipeline_mode<synchronous>, transform_indices = @transform_7, window_bounds = array<i64: 1, 256>}, {transform_indices = @transform_8, window_bounds = array<i64: 128, 128>}]} {
    %c0 = arith.constant 0 : index
    %c0_0 = arith.constant 0 : index
    %0 = vector.load %arg1[%c0, %c0_0] : memref<128x128xi8, #tpu.memory_space<vmem>>, vector<128x128xi8>
    %1 = arith.sitofp %0 : vector<128x128xi8> to vector<128x128xf32>
    %2 = arith.truncf %1 : vector<128x128xf32> to vector<128x128xbf16>
    %c0_1 = arith.constant 0 : index
    %c0_2 = arith.constant 0 : index
    %3 = vector.load %arg3[%c0_1, %c0_2] : memref<128x128xbf16, #tpu.memory_space<vmem>>, vector<128x128xbf16>
    %cst = arith.constant dense<0.000000e+00> : vector<128x128xf32>
    %4 = tpu.matmul %2, %3, %cst {dimension_numbers = #tpu.dot_dimension_numbers<[1], [0], [0], [1], [0, 0, 1, 1], [], []>} : vector<128x128xbf16>, vector<128x128xbf16>, vector<128x128xf32> -> vector<128x128xf32>
    %c0_3 = arith.constant 0 : index
    %c0_4 = arith.constant 0 : index
    %5 = vector.load %arg2[%c0_3, %c0_4] : memref<128x1xf32, #tpu.memory_space<vmem>>, vector<128x1xf32>
    %6 = vector.broadcast %5 : vector<128x1xf32> to vector<128x128xf32>
    %7 = arith.mulf %4, %6 : vector<128x128xf32>
    %8 = arith.truncf %7 : vector<128x128xf32> to vector<128x128xbf16>
    %c0_5 = arith.constant 0 : index
    %c0_6 = arith.constant 0 : index
    %9 = vector.load %arg5[%c0_5, %c0_6] : memref<128x256xbf16, #tpu.memory_space<vmem>>, vector<128x256xbf16>
    %cst_7 = arith.constant dense<0.000000e+00> : vector<128x256xf32>
    %10 = tpu.matmul %8, %9, %cst_7 {dimension_numbers = #tpu.dot_dimension_numbers<[1], [0], [0], [1], [0, 0, 1, 1], [], []>} : vector<128x128xbf16>, vector<128x256xbf16>, vector<128x256xf32> -> vector<128x256xf32>
    %c0_8 = arith.constant 0 : index
    %c0_9 = arith.constant 0 : index
    %11 = vector.load %arg6[%c0_8, %c0_9] : memref<1x256xf32, #tpu.memory_space<vmem>>, vector<1x256xf32>
    %12 = vector.broadcast %11 : vector<1x256xf32> to vector<128x256xf32>
    %13 = arith.addf %10, %12 : vector<128x256xf32>
    %c0_10 = arith.constant 0 : index
    %c0_11 = arith.constant 0 : index
    %14 = vector.load %arg4[%c0_10, %c0_11] : memref<128x128xbf16, #tpu.memory_space<vmem>>, vector<128x128xbf16>
    %c0_12 = arith.constant 0 : index
    %c0_13 = arith.constant 0 : index
    %15 = vector.load %arg7[%c0_12, %c0_13] : memref<128x256xbf16, #tpu.memory_space<vmem>>, vector<128x256xbf16>
    %cst_14 = arith.constant dense<0.000000e+00> : vector<128x256xf32>
    %16 = tpu.matmul %14, %15, %cst_14 {dimension_numbers = #tpu.dot_dimension_numbers<[1], [0], [0], [1], [0, 0, 1, 1], [], []>} : vector<128x128xbf16>, vector<128x256xbf16>, vector<128x256xf32> -> vector<128x256xf32>
    %c0_15 = arith.constant 0 : index
    %c0_16 = arith.constant 0 : index
    %17 = vector.load %arg8[%c0_15, %c0_16] : memref<1x256xf32, #tpu.memory_space<vmem>>, vector<1x256xf32>
    %18 = vector.broadcast %17 : vector<1x256xf32> to vector<128x256xf32>
    %19 = arith.addf %16, %18 : vector<128x256xf32>
    %20 = vector.extract_strided_slice %13 {offsets = [0, 0], sizes = [128, 128], strides = [1, 1]} : vector<128x256xf32> to vector<128x128xf32>
    %21 = vector.extract_strided_slice %13 {offsets = [0, 128], sizes = [128, 128], strides = [1, 1]} : vector<128x256xf32> to vector<128x128xf32>
    %22 = vector.extract_strided_slice %19 {offsets = [0, 0], sizes = [128, 128], strides = [1, 1]} : vector<128x256xf32> to vector<128x128xf32>
    %23 = vector.extract_strided_slice %19 {offsets = [0, 128], sizes = [128, 1], strides = [1, 1]} : vector<128x256xf32> to vector<128x1xf32>
    %24 = arith.negf %23 : vector<128x1xf32>
    %25 = math.exp %24 : vector<128x1xf32>
    %cst_17 = arith.constant 1.000000e+00 : f32
    %26 = vector.broadcast %cst_17 : f32 to vector<128x1xf32>
    %27 = arith.addf %26, %25 : vector<128x1xf32>
    %28 = arith.divf %26, %27 : vector<128x1xf32>
    %29 = arith.subf %20, %21 : vector<128x128xf32>
    %30 = vector.broadcast %28 : vector<128x1xf32> to vector<128x128xf32>
    %31 = arith.mulf %30, %29 : vector<128x128xf32>
    %32 = arith.addf %21, %31 : vector<128x128xf32>
    %cst_18 = arith.constant 0.000000e+00 : f32
    %33 = vector.broadcast %cst_18 : f32 to vector<128x128xf32>
    %34 = arith.maximumf %32, %33 : vector<128x128xf32>
    %35 = arith.addf %22, %34 : vector<128x128xf32>
    %cst_19 = arith.constant 0.000000e+00 : f32
    %36 = vector.broadcast %cst_19 : f32 to vector<128x128xf32>
    %37 = arith.maximumf %35, %36 : vector<128x128xf32>
    %38 = arith.truncf %37 : vector<128x128xf32> to vector<128x128xbf16>
    %c0_20 = arith.constant 0 : index
    %c0_21 = arith.constant 0 : index
    %39 = vector.load %arg9[%c0_20, %c0_21] : memref<128x128xbf16, #tpu.memory_space<vmem>>, vector<128x128xbf16>
    tpu.vector_store %arg9[%c0_20, %c0_21], %38 {strides = array<i32>} : memref<128x128xbf16, #tpu.memory_space<vmem>>, vector<128x128xbf16>,
    return
  }
  func.func @transform_0(%arg0: i32) -> (i32, i32) {
    %c0_i32 = arith.constant 0 : i32
    %c0_i32_0 = arith.constant 0 : i32
    return %arg0, %c0_i32 : i32, i32
  }
  func.func @transform_1(%arg0: i32) -> (i32, i32) {
    %c0_i32 = arith.constant 0 : i32
    %c0_i32_0 = arith.constant 0 : i32
    return %arg0, %c0_i32 : i32, i32
  }
  func.func @transform_2(%arg0: i32) -> (i32, i32) {
    %c0_i32 = arith.constant 0 : i32
    %c0_i32_0 = arith.constant 0 : i32
    %c0_i32_1 = arith.constant 0 : i32
    return %c0_i32, %c0_i32_0 : i32, i32
  }
  func.func @transform_3(%arg0: i32) -> (i32, i32) {
    %c0_i32 = arith.constant 0 : i32
    %c0_i32_0 = arith.constant 0 : i32
    return %arg0, %c0_i32 : i32, i32
  }
  func.func @transform_4(%arg0: i32) -> (i32, i32) {
    %c0_i32 = arith.constant 0 : i32
    %c0_i32_0 = arith.constant 0 : i32
    %c0_i32_1 = arith.constant 0 : i32
    return %c0_i32, %c0_i32_0 : i32, i32
  }
  func.func @transform_5(%arg0: i32) -> (i32, i32) {
    %c0_i32 = arith.constant 0 : i32
    %c0_i32_0 = arith.constant 0 : i32
    %c0_i32_1 = arith.constant 0 : i32
    return %c0_i32, %c0_i32_0 : i32, i32
  }
  func.func @transform_6(%arg0: i32) -> (i32, i32) {
    %c0_i32 = arith.constant 0 : i32
    %c0_i32_0 = arith.constant 0 : i32
    %c0_i32_1 = arith.constant 0 : i32
    return %c0_i32, %c0_i32_0 : i32, i32
  }
  func.func @transform_7(%arg0: i32) -> (i32, i32) {
    %c0_i32 = arith.constant 0 : i32
    %c0_i32_0 = arith.constant 0 : i32
    %c0_i32_1 = arith.constant 0 : i32
    return %c0_i32, %c0_i32_0 : i32, i32
  }
  func.func @transform_8(%arg0: i32) -> (i32, i32) {
    %c0_i32 = arith.constant 0 : i32
    %c0_i32_0 = arith.constant 0 : i32
    return %arg0, %c0_i32 : i32, i32
  }
}

module attributes {stable_mosaic.version = 11 : i64} {
  func.func @kernel(%arg0: i32, %arg1: memref<128x128xi8, #tpu.memory_space<vmem>>, %arg2: memref<128x1xf32, #tpu.memory_space<vmem>>, %arg3: memref<128x128xbf16, #tpu.memory_space<vmem>>, %arg4: memref<128x128xbf16, #tpu.memory_space<vmem>>, %arg5: memref<128x256xbf16, #tpu.memory_space<vmem>>, %arg6: memref<1x256xf32, #tpu.memory_space<vmem>>, %arg7: memref<128x256xbf16, #tpu.memory_space<vmem>>, %arg8: memref<1x256xf32, #tpu.memory_space<vmem>>, %arg9: memref<128x128xbf16, #tpu.memory_space<vmem>>) attributes {dimension_semantics = [#tpu.dimension_semantics<parallel>], iteration_bounds = array<i64: 1>, scalar_prefetch = 0 : i64, scratch_operands = 0 : i64, tpu.core_type = #tpu.core_type<tc>, window_params = [{transform_indices = @transform_0, window_bounds = array<i64: 128, 128>}, {transform_indices = @transform_1, window_bounds = array<i64: 128, 1>}, {pipeline_mode = #tpu.pipeline_mode<synchronous>, transform_indices = @transform_2, window_bounds = array<i64: 128, 128>}, {transform_indices = @transform_3, window_bounds = array<i64: 128, 128>}, {pipeline_mode = #tpu.pipeline_mode<synchronous>, transform_indices = @transform_4, window_bounds = array<i64: 128, 256>}, {pipeline_mode = #tpu.pipeline_mode<synchronous>, transform_indices = @transform_5, window_bounds = array<i64: 1, 256>}, {pipeline_mode = #tpu.pipeline_mode<synchronous>, transform_indices = @transform_6, window_bounds = array<i64: 128, 256>}, {pipeline_mode = #tpu.pipeline_mode<synchronous>, transform_indices = @transform_7, window_bounds = array<i64: 1, 256>}, {transform_indices = @transform_8, window_bounds = array<i64: 128, 128>}]} {
    %c0 = arith.constant 0 : index
    %c0_0 = arith.constant 0 : index
    %0 = vector.load %arg1[%c0, %c0_0] : memref<128x128xi8, #tpu.memory_space<vmem>>, vector<128x128xi8>
    %1 = arith.sitofp %0 : vector<128x128xi8> to vector<128x128xf32>
    %2 = arith.truncf %1 : vector<128x128xf32> to vector<128x128xbf16>
    %c0_1 = arith.constant 0 : index
    %c0_2 = arith.constant 0 : index
    %3 = vector.load %arg3[%c0_1, %c0_2] : memref<128x128xbf16, #tpu.memory_space<vmem>>, vector<128x128xbf16>
    %cst = arith.constant dense<0.000000e+00> : vector<128x128xf32>
    %4 = tpu.matmul %2, %3, %cst {dimension_numbers = #tpu.dot_dimension_numbers<[1], [0], [0], [1], [0, 0, 1, 1], [], []>} : vector<128x128xbf16>, vector<128x128xbf16>, vector<128x128xf32> -> vector<128x128xf32>
    %c0_3 = arith.constant 0 : index
    %c0_4 = arith.constant 0 : index
    %5 = vector.load %arg2[%c0_3, %c0_4] : memref<128x1xf32, #tpu.memory_space<vmem>>, vector<128x1xf32>
    %6 = vector.broadcast %5 : vector<128x1xf32> to vector<128x128xf32>
    %7 = arith.mulf %4, %6 : vector<128x128xf32>
    %8 = arith.truncf %7 : vector<128x128xf32> to vector<128x128xbf16>
    %c0_5 = arith.constant 0 : index
    %c0_6 = arith.constant 0 : index
    %9 = vector.load %arg5[%c0_5, %c0_6] : memref<128x256xbf16, #tpu.memory_space<vmem>>, vector<128x256xbf16>
    %cst_7 = arith.constant dense<0.000000e+00> : vector<128x256xf32>
    %10 = tpu.matmul %8, %9, %cst_7 {dimension_numbers = #tpu.dot_dimension_numbers<[1], [0], [0], [1], [0, 0, 1, 1], [], []>} : vector<128x128xbf16>, vector<128x256xbf16>, vector<128x256xf32> -> vector<128x256xf32>
    %c0_8 = arith.constant 0 : index
    %c0_9 = arith.constant 0 : index
    %11 = vector.load %arg6[%c0_8, %c0_9] : memref<1x256xf32, #tpu.memory_space<vmem>>, vector<1x256xf32>
    %12 = vector.broadcast %11 : vector<1x256xf32> to vector<128x256xf32>
    %13 = arith.addf %10, %12 : vector<128x256xf32>
    %c0_10 = arith.constant 0 : index
    %c0_11 = arith.constant 0 : index
    %14 = vector.load %arg4[%c0_10, %c0_11] : memref<128x128xbf16, #tpu.memory_space<vmem>>, vector<128x128xbf16>
    %c0_12 = arith.constant 0 : index
    %c0_13 = arith.constant 0 : index
    %15 = vector.load %arg7[%c0_12, %c0_13] : memref<128x256xbf16, #tpu.memory_space<vmem>>, vector<128x256xbf16>
    %cst_14 = arith.constant dense<0.000000e+00> : vector<128x256xf32>
    %16 = tpu.matmul %14, %15, %cst_14 {dimension_numbers = #tpu.dot_dimension_numbers<[1], [0], [0], [1], [0, 0, 1, 1], [], []>} : vector<128x128xbf16>, vector<128x256xbf16>, vector<128x256xf32> -> vector<128x256xf32>
    %c0_15 = arith.constant 0 : index
    %c0_16 = arith.constant 0 : index
    %17 = vector.load %arg8[%c0_15, %c0_16] : memref<1x256xf32, #tpu.memory_space<vmem>>, vector<1x256xf32>
    %18 = vector.broadcast %17 : vector<1x256xf32> to vector<128x256xf32>
    %19 = arith.addf %16, %18 : vector<128x256xf32>
    %20 = vector.extract_strided_slice %13 {offsets = [0, 0], sizes = [128, 128], strides = [1, 1]} : vector<128x256xf32> to vector<128x128xf32>
    %21 = vector.extract_strided_slice %13 {offsets = [0, 128], sizes = [128, 128], strides = [1, 1]} : vector<128x256xf32> to vector<128x128xf32>
    %22 = vector.extract_strided_slice %19 {offsets = [0, 0], sizes = [128, 128], strides = [1, 1]} : vector<128x256xf32> to vector<128x128xf32>
    %23 = vector.extract_strided_slice %19 {offsets = [0, 128], sizes = [128, 1], strides = [1, 1]} : vector<128x256xf32> to vector<128x1xf32>
    %24 = arith.negf %23 : vector<128x1xf32>
    %25 = math.exp %24 : vector<128x1xf32>
    %cst_17 = arith.constant 1.000000e+00 : f32
    %26 = vector.broadcast %cst_17 : f32 to vector<128x1xf32>
    %27 = arith.addf %26, %25 : vector<128x1xf32>
    %28 = arith.divf %26, %27 : vector<128x1xf32>
    %29 = arith.subf %20, %21 : vector<128x128xf32>
    %30 = vector.broadcast %28 : vector<128x1xf32> to vector<128x128xf32>
    %31 = arith.mulf %30, %29 : vector<128x128xf32>
    %32 = arith.addf %21, %31 : vector<128x128xf32>
    %cst_18 = arith.constant 0.000000e+00 : f32
    %33 = vector.broadcast %cst_18 : f32 to vector<128x128xf32>
    %34 = arith.maximumf %32, %33 : vector<128x128xf32>
    %35 = arith.addf %22, %34 : vector<128x128xf32>
    %36 = arith.truncf %35 : vector<128x128xf32> to vector<128x128xbf16>
    %c0_19 = arith.constant 0 : index
    %c0_20 = arith.constant 0 : index
    %37 = vector.load %arg9[%c0_19, %c0_20] : memref<128x128xbf16, #tpu.memory_space<vmem>>, vector<128x128xbf16>
    tpu.vector_store %arg9[%c0_19, %c0_20], %36 {strides = array<i32>} : memref<128x128xbf16, #tpu.memory_space<vmem>>, vector<128x128xbf16>,
    return
  }
  func.func @transform_0(%arg0: i32) -> (i32, i32) {
    %c0_i32 = arith.constant 0 : i32
    %c0_i32_0 = arith.constant 0 : i32
    return %arg0, %c0_i32 : i32, i32
  }
  func.func @transform_1(%arg0: i32) -> (i32, i32) {
    %c0_i32 = arith.constant 0 : i32
    %c0_i32_0 = arith.constant 0 : i32
    return %arg0, %c0_i32 : i32, i32
  }
  func.func @transform_2(%arg0: i32) -> (i32, i32) {
    %c0_i32 = arith.constant 0 : i32
    %c0_i32_0 = arith.constant 0 : i32
    %c0_i32_1 = arith.constant 0 : i32
    return %c0_i32, %c0_i32_0 : i32, i32
  }
  func.func @transform_3(%arg0: i32) -> (i32, i32) {
    %c0_i32 = arith.constant 0 : i32
    %c0_i32_0 = arith.constant 0 : i32
    return %arg0, %c0_i32 : i32, i32
  }
  func.func @transform_4(%arg0: i32) -> (i32, i32) {
    %c0_i32 = arith.constant 0 : i32
    %c0_i32_0 = arith.constant 0 : i32
    %c0_i32_1 = arith.constant 0 : i32
    return %c0_i32, %c0_i32_0 : i32, i32
  }
  func.func @transform_5(%arg0: i32) -> (i32, i32) {
    %c0_i32 = arith.constant 0 : i32
    %c0_i32_0 = arith.constant 0 : i32
    %c0_i32_1 = arith.constant 0 : i32
    return %c0_i32, %c0_i32_0 : i32, i32
  }
  func.func @transform_6(%arg0: i32) -> (i32, i32) {
    %c0_i32 = arith.constant 0 : i32
    %c0_i32_0 = arith.constant 0 : i32
    %c0_i32_1 = arith.constant 0 : i32
    return %c0_i32, %c0_i32_0 : i32, i32
  }
  func.func @transform_7(%arg0: i32) -> (i32, i32) {
    %c0_i32 = arith.constant 0 : i32
    %c0_i32_0 = arith.constant 0 : i32
    %c0_i32_1 = arith.constant 0 : i32
    return %c0_i32, %c0_i32_0 : i32, i32
  }
  func.func @transform_8(%arg0: i32) -> (i32, i32) {
    %c0_i32 = arith.constant 0 : i32
    %c0_i32_0 = arith.constant 0 : i32
    return %arg0, %c0_i32 : i32, i32
  }
}

</mosaic_0001>

<bundles_post_ra>
// kernel: lasage_s_forward.2
= control target key start
LH: loop header
LB: loop body
LE: loop exit
PB: predicated region body
PF: predicated region fallthrough
CT: control target
= control target key end

     0   :  { %v1523_v1 = vmov 0   ;;  %s2046_s2 = inlined_call_operand.vmem [shape: bf16[128,128], index: 2, kind: input, shape index: {}, may-alias: {2,3}]   ;;  %s2047_s0 = inlined_call_operand.vmem [shape: s8[128,128], index: 0, kind: input, shape index: {}]   ;;  %s2048_s6 = inlined_call_operand.vmem [shape: bf16[128,256], index: 6, kind: input, shape index: {}]   ;;  %s2049_s3 = inlined_call_operand.vmem [shape: bf16[128,128], index: 3, kind: input, shape index: {}, may-alias: {2,3}]   ;;  %s2050_s1 = inlined_call_operand.vmem [shape: f32[128,1], index: 1, kind: input, shape index: {}]   ;;  %s2051_s4 = inlined_call_operand.vmem [shape: bf16[128,256], index: 4, kind: input, shape index: {}]   ;;  %s2052_s7 = inlined_call_operand.vmem [shape: f32[1,256], index: 7, kind: input, shape index: {}]   ;;  %s2053_s5 = inlined_call_operand.vmem [shape: f32[1,256], index: 5, kind: input, shape index: {}]   ;;  %s2054_s8 = inlined_call_operand.vmem [shape: bf16[128,128], index: 8, kind: output, shape index: {}]  }
   0x1   :  { %v1395_v0 = vld [vmem:[%s2046_s2] sm:$0xff]   ;;  %1393 = vset.pattern.permute.xlu0 %v1523_v1  ;;  %1394 = vset.pattern.permute.xlu1 %v1523_v1  ;;  %v1396_v2 = vld [vmem:[%s2046_s2 + $0x8] sm:$0xff]   ;;  %v1397_v3 = vld [vmem:[%s2046_s2 + $0x10] sm:$0xff]  }
   0x2   :  { %463 = vmatprep.mubr.bf16.mxu1 %v1523_v1  ;;  %1344 = vmatprep.subr.bf16.mxu0 %v1395_v0  ;;  %v1398_v4 = vld [vmem:[%s2046_s2 + $0x18] sm:$0xff]   ;;  %v30_v5 = vld [vmem:[%s2047_s0] sm:$0xff]  ;;  %v1400_v8 = vld [vmem:[%s2046_s2 + $0x28] sm:$0xff]  }
   0x3   :  { %1345 = vmatpush3.bf16.msra.mxu0 %v1395_v0  ;;  %v34_v6 = vunpack.c.l.s8.bf16 %v30_v5  ;;  %v1399_v7 = vld [vmem:[%s2046_s2 + $0x20] sm:$0xff]   ;;  %v1401_v9 = vld [vmem:[%s2046_s2 + $0x30] sm:$0xff]   ;;  %v1402_v11 = vld [vmem:[%s2046_s2 + $0x38] sm:$0xff]   ;;  %v35_v18 = vunpack.c.h.s8.bf16 %v30_v5 }
   0x4   :  { %1346 = vmatprep.subr.bf16.mxu0 %v1396_v2  ;;  %v203_v10 = vld [vmem:[%s2050_s1] sm:$0xff]  ;;  %v205_v12 = vld [vmem:[%s2050_s1 + $0x10] sm:$0xff]  ;;  %v204_v13 = vld [vmem:[%s2050_s1 + $0x8] sm:$0xff] }
   0x5   :  { %1360 = vmatprep.mubr.bf16.mxu0 %v34_v6  ;;  %221 = vperm.xlu0 %1393, %v203_v10   ;;  %v206_v14 = vld [vmem:[%s2050_s1 + $0x18] sm:$0xff]  ;;  %v1614_v15 = vld [vmem:[%s2048_s6 + $0x4] ss:$8 sps:$4 sm:$0xff]   ;;  %v1625_v19 = vld [vmem:[%s2048_s6] ss:$8 sps:$4 sm:$0xff]  }
   0x6   :  { %231 = vperm.xlu1 %1394, %v205_v12   ;;  %v31_v16 = vld [vmem:[%s2047_s0 + $0x8] sm:$0xff]  ;;  %v207_v17 = vld [vmem:[%s2050_s1 + $0x20] sm:$0xff]  ;;  %v1633_v21 = vld [vmem:[%s2048_s6 + $0x14] ss:$8 sps:$4 sm:$0xff]   ;;  %v341_v12 = vlaneseq }
   0x7   :  { %1347 = vmatpush3.bf16.msra.mxu0 %v1396_v2  ;;  %v208_v20 = vld [vmem:[%s2050_s1 + $0x28] sm:$0xff]  ;;  %v36_v22 = vunpack.c.l.s8.bf16 %v31_v16  ;;  %v209_v23 = vld [vmem:[%s2050_s1 + $0x30] sm:$0xff]  ;;  %v210_v26 = vld [vmem:[%s2050_s1 + $0x38] sm:$0xff]  ;;  %v37_v35 = vunpack.c.h.s8.bf16 %v31_v16 }
   0x8   :  { %1348 = vmatprep.subr.bf16.mxu0 %v1397_v3  ;;  %v1433_v24 = vld [vmem:[%s2051_s4 + $0x4] ss:$8 sps:$4 sm:$0xff]   ;;  %v1645_v25 = vld [vmem:[%s2048_s6 + $0x10] ss:$8 sps:$4 sm:$0xff]   ;;  %v1435_v27 = vld [vmem:[%s2051_s4] ss:$8 sps:$4 sm:$0xff]  }
   0x9   :  { %226 = vperm.xlu0 %1393, %v204_v13   ;;  %v1656_v28 = vld [vmem:[%s2048_s6 + $0x24] ss:$8 sps:$4 sm:$0xff]   ;;  %v32_v29 = vld [vmem:[%s2047_s0 + $0x10] sm:$0xff]  ;;  %431 = vmatprep.subr.bf16.mxu1 %v1433_v24  ;;  %v1682_v36 = vld [vmem:[%s2048_s6 + $0x20] ss:$8 sps:$4 sm:$0xff]   ;;  %v1825_v13 = vshrl.u32 %v341_v12, 7 }
   0xa   :  { %236 = vperm.xlu1 %1394, %v206_v14   ;;  %v1436_v30 = vld [vmem:[%s2051_s4 + $0x14] ss:$8 sps:$4 sm:$0xff]   ;;  %v211_v31 = vld [vmem:[%s2050_s1 + $0x40] sm:$0xff]  ;;  %v1438_v32 = vld [vmem:[%s2051_s4 + $0x10] ss:$8 sps:$4 sm:$0xff]   ;;  %432 = vmatpush1.bf16.msra.mxu1 %v1435_v27  ;;  %v38_v38 = vunpack.c.l.s8.bf16 %v32_v29  ;;  %v39_v48 = vunpack.c.h.s8.bf16 %v32_v29 }
   0xb   :  { %1349 = vmatpush3.bf16.msra.mxu0 %v1397_v3  ;;  %v212_v33 = vld [vmem:[%s2050_s1 + $0x48] sm:$0xff]  ;;  %433 = vmatprep.subr.bf16.mxu1 %v1436_v30  ;;  %v1687_v37 = vld [vmem:[%s2048_s6 + $0x34] ss:$8 sps:$4 sm:$0xff]   ;;  %v1706_v43 = vld [vmem:[%s2048_s6 + $0x30] ss:$8 sps:$4 sm:$0xff]   ;;  %v343_v14 = vsub.s32 0, %v1825_v13 }
   0xc   :  { %1350 = vmatprep.subr.bf16.mxu0 %v1398_v4  ;;  %v1439_v34 = vld [vmem:[%s2051_s4 + $0x24] ss:$8 sps:$4 sm:$0xff]   ;;  %v213_v39 = vld [vmem:[%s2050_s1 + $0x50] sm:$0xff]  ;;  %v1441_v40 = vld [vmem:[%s2051_s4 + $0x20] ss:$8 sps:$4 sm:$0xff]   ;;  %v347_v12 = vsub.s32 1, %v1825_v13 }
   0xd   :  { %241 = vperm.xlu0 %1393, %v207_v17   ;;  %v214_v41 = vld [vmem:[%s2050_s1 + $0x58] sm:$0xff]  ;;  %v1712_v44 = vld [vmem:[%s2048_s6 + $0x44] ss:$8 sps:$4 sm:$0xff]   ;;  %v1733_v51 = vld [vmem:[%s2048_s6 + $0x40] ss:$8 sps:$4 sm:$0xff]  }
   0xe   :  { %246 = vperm.xlu1 %1394, %v208_v20   ;;  %434 = vmatpush1.bf16.msra.mxu1 %v1438_v32  ;;  %v1442_v42 = vld [vmem:[%s2051_s4 + $0x34] ss:$8 sps:$4 sm:$0xff]   ;;  %v215_v46 = vld [vmem:[%s2050_s1 + $0x60] sm:$0xff]  ;;  %v1444_v47 = vld [vmem:[%s2051_s4 + $0x30] ss:$8 sps:$4 sm:$0xff]  }
   0xf   :  { %1351 = vmatpush3.bf16.msra.mxu0 %v1398_v4  ;;  %435 = vmatprep.subr.bf16.mxu1 %v1439_v34  ;;  %v33_v45 = vld [vmem:[%s2047_s0 + $0x18] sm:$0xff]  ;;  %v216_v49 = vld [vmem:[%s2050_s1 + $0x68] sm:$0xff]  ;;  %v217_v54 = vld [vmem:[%s2050_s1 + $0x70] sm:$0xff] }
  0x10   :  { %1352 = vmatprep.subr.bf16.mxu0 %v1399_v7  ;;  %v1445_v50 = vld [vmem:[%s2051_s4 + $0x44] ss:$8 sps:$4 sm:$0xff]   ;;  %v40_v52 = vunpack.c.l.s8.bf16 %v33_v45  ;;  %v1739_v53 = vld [vmem:[%s2048_s6 + $0x54] ss:$8 sps:$4 sm:$0xff]   ;;  %v1447_v55 = vld [vmem:[%s2051_s4 + $0x40] ss:$8 sps:$4 sm:$0xff]   ;;  %v41_v61 = vunpack.c.h.s8.bf16 %v33_v45 }
  0x11   :  { %251 = vperm.xlu0 %1393, %v209_v23   ;;  %v218_v56 = vld [vmem:[%s2050_s1 + $0x78] sm:$0xff]  ;;  %v1763_v59 = vld [vmem:[%s2048_s6 + $0x64] ss:$8 sps:$4 sm:$0xff]   ;;  %v1775_v63 = vld [vmem:[%s2048_s6 + $0x60] ss:$8 sps:$4 sm:$0xff]  }
  0x12   :  { %256 = vperm.xlu1 %1394, %v210_v26   ;;  %436 = vmatpush1.bf16.msra.mxu1 %v1441_v40  ;;  %v1448_v57 = vld [vmem:[%s2051_s4 + $0x54] ss:$8 sps:$4 sm:$0xff]   ;;  %v1757_v58 = vld [vmem:[%s2048_s6 + $0x50] ss:$8 sps:$4 sm:$0xff]   ;;  %v1451_v62 = vld [vmem:[%s2051_s4 + $0x64] ss:$8 sps:$4 sm:$0xff]  }
  0x13   :  { %1353 = vmatpush3.bf16.msra.mxu0 %v1399_v7  ;;  %437 = vmatprep.subr.bf16.mxu1 %v1442_v42  ;;  %v1450_v60 = vld [vmem:[%s2051_s4 + $0x50] ss:$8 sps:$4 sm:$0xff]   ;;  %v1781_v0 = vld [vmem:[%s2048_s6 + $0x74] ss:$8 sps:$4 sm:$0xff]   ;;  %v1427_v3 = vld [vmem:[%s2049_s3] sm:$0xff]  }
  0x14   :  { %1354 = vmatprep.subr.bf16.mxu0 %v1400_v8  ;;  %v1787_v2 = vld [vmem:[%s2048_s6 + $0x70] ss:$8 sps:$4 sm:$0xff]   ;;  %v1428_v4 = vld [vmem:[%s2049_s3 + $0x8] sm:$0xff]   ;;  %v1431_v7 = vld [vmem:[%s2049_s3 + $0x20] sm:$0xff]  }
  0x15   :  { %261 = vperm.xlu0 %1393, %v211_v31   ;;  %v1429_v5 = vld [vmem:[%s2049_s3 + $0x10] sm:$0xff]   ;;  %v1430_v6 = vld [vmem:[%s2049_s3 + $0x18] sm:$0xff]   ;;  %v1831_v16 = vld [vmem:[%s2052_s7] sm:$0x3] }
  0x16   :  { %266 = vperm.xlu1 %1394, %v212_v33   ;;  %438 = vmatpush1.bf16.msra.mxu1 %v1444_v47  ;;  %v1454_v10 = vld [vmem:[%s2051_s4 + $0x74] ss:$8 sps:$4 sm:$0xff]   ;;  %v1836_v17 = vrot.slane %v1831_v16, %v343_v14 }
  0x17   :  { %1355 = vmatpush3.bf16.msra.mxu0 %v1400_v8  ;;  %439 = vmatprep.subr.bf16.mxu1 %v1445_v50  ;;  %v1432_v8 = vld [vmem:[%s2049_s3 + $0x28] sm:$0xff]  }
  0x18   :  { %1356 = vmatprep.subr.bf16.mxu0 %v1401_v9 }
  0x19   :  { %271 = vperm.xlu0 %1393, %v213_v39  }
  0x1a   :  { %276 = vperm.xlu1 %1394, %v214_v41   ;;  %440 = vmatpush1.bf16.msra.mxu1 %v1447_v55 }
  0x1b   :  { %1357 = vmatpush3.bf16.msra.mxu0 %v1401_v9  ;;  %441 = vmatprep.subr.bf16.mxu1 %v1448_v57  ;;  %v1453_v9 = vld [vmem:[%s2051_s4 + $0x60] ss:$8 sps:$4 sm:$0xff]  }
  0x1c   :  { %1358 = vmatprep.subr.bf16.mxu0 %v1402_v11 }
  0x1d   :  { %281 = vperm.xlu0 %1393, %v215_v46  }
  0x1e   :  { %286 = vperm.xlu1 %1394, %v216_v49   ;;  %442 = vmatpush1.bf16.msra.mxu1 %v1450_v60 }
  0x1f   :  { %1359 = vmatpush3.bf16.msra.mxu0 %v1402_v11  ;;  %443 = vmatprep.subr.bf16.mxu1 %v1451_v62  ;;  %v1456_v11 = vld [vmem:[%s2051_s4 + $0x70] ss:$8 sps:$4 sm:$0xff]  }
  0x20   :  { %716 = vmatprep.subr.bf16.mxu0 %v1614_v15 }
  0x21   :  { %291 = vperm.xlu0 %1393, %v217_v54  }
  0x22   :  { %1361 = vmatmul.mubr.bf16.vlgmr.msra.gmra.mrb[0].mxu0 %v35_v18  ;;  %296 = vperm.xlu1 %1394, %v218_v56  }
  0x23   :  { %717 = vmatpush1.bf16.msra.mxu0 %v1625_v19  ;;  %1364 = vmatprep.mubr.bf16.mxu0 %v36_v22 }
  0x24   :  { %718 = vmatprep.subr.bf16.mxu0 %v1633_v21  ;;  %444 = vmatpush1.bf16.msra.mxu1 %v1453_v9 }
  0x25   :  { %445 = vmatprep.subr.bf16.mxu1 %v1454_v10 }
  0x27   :  { %719 = vmatpush1.bf16.msra.mxu0 %v1645_v25 }
  0x28   :  { %720 = vmatprep.subr.bf16.mxu0 %v1656_v28  ;;  %446 = vmatpush1.bf16.msra.mxu1 %v1456_v11 }
  0x29   :  { %1376 = vmatprep.subr.bf16.mxu1 %v1614_v15 }
  0x2a   :  { %1365 = vmatmul.mubr.bf16.gmra.mrb[4].mxu0 %v37_v35 }
  0x2b   :  { %721 = vmatpush1.bf16.msra.mxu0 %v1682_v36  ;;  %1368 = vmatprep.mubr.bf16.mxu0 %v38_v38 }
  0x2c   :  { %722 = vmatprep.subr.bf16.mxu0 %v1687_v37 }
  0x2f   :  { %723 = vmatpush1.bf16.msra.mxu0 %v1706_v43 }
  0x30   :  { %724 = vmatprep.subr.bf16.mxu0 %v1712_v44 }
  0x32   :  { %1369 = vmatmul.mubr.bf16.gmra.mrb[8].mxu0 %v39_v48 }
  0x33   :  { %725 = vmatpush1.bf16.msra.mxu0 %v1733_v51  ;;  %1372 = vmatprep.mubr.bf16.mxu0 %v40_v52 }
  0x34   :  { %726 = vmatprep.subr.bf16.mxu0 %v1739_v53 }
  0x37   :  { %727 = vmatpush1.bf16.msra.mxu0 %v1757_v58 }
  0x38   :  { %728 = vmatprep.subr.bf16.mxu0 %v1763_v59 }
  0x3a   :  { %1373 = vmatmul.mubr.bf16.gmra.mrb[12].mxu0 %v41_v61 }
  0x3b   :  { %729 = vmatpush1.bf16.msra.mxu0 %v1775_v63  ;;  %748 = vmatprep.mubr.bf16.mxu0 %v1523_v1 }
  0x3c   :  { %730 = vmatprep.subr.bf16.mxu0 %v1781_v0 }
  0x3f   :  { %731 = vmatpush1.bf16.msra.mxu0 %v1787_v2 }
  0x42   :  { %749 = vmatmul.mubr.bf16.vlgmr.msra.gmra.mrb[16].mxu0 %v1427_v3 }
  0x43   :  { %758 = vmatprep.mubr.bf16.mxu0 %v1523_v1 }
  0x4a   :  { %759 = vmatmul.mubr.bf16.gmra.mrb[20].mxu0 %v1428_v4 }
  0x4b   :  { %768 = vmatprep.mubr.bf16.mxu0 %v1523_v1 }
  0x52   :  { %769 = vmatmul.mubr.bf16.gmra.mrb[24].mxu0 %v1429_v5 }
  0x53   :  { %778 = vmatprep.mubr.bf16.mxu0 %v1523_v1 }
  0x5a   :  { %779 = vmatmul.mubr.bf16.gmra.mrb[28].mxu0 %v1430_v6 }
  0x5b   :  { %788 = vmatprep.mubr.bf16.mxu0 %v1523_v1 }
  0x62   :  { %789 = vmatmul.mubr.bf16.gmra.mrb[32].mxu0 %v1431_v7 }
  0x63   :  { %798 = vmatprep.mubr.bf16.mxu0 %v1523_v1 }
  0x6a   :  { %799 = vmatmul.mubr.bf16.gmra.mrb[36].mxu0 %v1432_v8 }
  0x84   :  { %v222_v18 = vpop.permute.xlu0 %221 }
  0x85   :  { %v232_v20 = vpop.permute.xlu1 %231 }
  0x88   :  { %v227_v22 = vpop.permute.xlu0 %226 }
  0x89   :  { %v237_v23 = vpop.permute.xlu1 %236 }
  0x8c   :  { %v242_v15 = vpop.permute.xlu0 %241 }
  0x8d   :  { %v247_v24 = vpop.permute.xlu1 %246 }
  0x90   :  { %v252_v27 = vpop.permute.xlu0 %251 }
  0x91   :  { %v257_v30 = vpop.permute.xlu1 %256 }
  0x94   :  { %v262_v41 = vpop.permute.xlu0 %261 }
  0x95   :  { %v267_v42 = vpop.permute.xlu1 %266 }
  0x98   :  { %v272_v55 = vpop.permute.xlu0 %271 }
  0x99   :  { %v277_v57 = vpop.permute.xlu1 %276 }
  0x9c   :  { %v282_v62 = vpop.permute.xlu0 %281 }
  0x9d   :  { %v287_v6 = vpop.permute.xlu1 %286 }
  0xa0   :  { %v292_v10 = vpop.permute.xlu0 %291 }
  0xf5   :  { %v1362_v26 = vpop.f32.mrb[0].mxu0 }
  0xf6   :  { %v140_v29 = vpop.f32.mrb[1].mxu0  ;;  %v301_v32 = vmul.f32 %v1362_v26, %v232_v20 }
  0xf7   :  { %v1363_v31 = vpop.f32.mrb[2].mxu0  ;;  %v299_v35 = vmul.f32 %v222_v18, %v140_v29 }
  0xf8   :  { %v302_v33 = vmul.f32 %v1363_v31, %v237_v23  ;;  %v143_v34 = vpop.f32.mrb[3].mxu0 }
  0xf9   :  { %v300_v38 = vmul.f32 %v227_v22, %v143_v34 }
  0xfa   :  { %v316_v39 = vpack.c.bf16 %v302_v33, %v301_v32 }
  0xfb   :  { %v315_v40 = vpack.c.bf16 %v300_v38, %v299_v35 }
  0xfd   :  { %v1366_v45 = vpop.f32.mrb[4].mxu0  ;;  %464 = vmatmul.mubr.bf16.vlgmr.msra.gmra.mrb[0].mxu1 %v315_v40 }
  0xfe   :  { %1384 = vmatpush1.bf16.msra.mxu1 %v1625_v19  ;;  %v156_v46 = vpop.f32.mrb[5].mxu0  ;;  %473 = vmatprep.mubr.bf16.mxu1 %v1523_v1  ;;  %v305_v48 = vmul.f32 %v1366_v45, %v252_v27 }
  0xff   :  { %v1367_v47 = vpop.f32.mrb[6].mxu0  ;;  %1377 = vmatprep.subr.bf16.mxu1 %v1633_v21  ;;  %v303_v52 = vmul.f32 %v242_v15, %v156_v46 }
 0x100   :  { %v306_v49 = vmul.f32 %v1367_v47, %v257_v30  ;;  %v159_v50 = vpop.f32.mrb[7].mxu0 }
 0x101   :  { %v304_v54 = vmul.f32 %v247_v24, %v159_v50 }
 0x102   :  { %v318_v56 = vpack.c.bf16 %v306_v49, %v305_v48  ;;  %1385 = vmatpush1.bf16.msra.mxu1 %v1645_v25 }
 0x103   :  { %v317_v60 = vpack.c.bf16 %v304_v54, %v303_v52  ;;  %1378 = vmatprep.subr.bf16.mxu1 %v1656_v28 }
 0x105   :  { %v1370_v19 = vpop.f32.mrb[8].mxu0  ;;  %474 = vmatmul.mubr.bf16.gmra.mrb[4].mxu1 %v316_v39 }
 0x106   :  { %v172_v61 = vpop.f32.mrb[9].mxu0  ;;  %483 = vmatprep.mubr.bf16.mxu1 %v1523_v1  ;;  %1386 = vmatpush1.bf16.msra.mxu1 %v1682_v36  ;;  %v309_v3 = vmul.f32 %v1370_v19, %v272_v55 }
 0x107   :  { %v1371_v21 = vpop.f32.mrb[10].mxu0  ;;  %1379 = vmatprep.subr.bf16.mxu1 %v1687_v37  ;;  %v307_v25 = vmul.f32 %v262_v41, %v172_v61  ;;  %v297_v37 = vpop.permute.xlu1 %296 }
 0x108   :  { %v310_v4 = vmul.f32 %v1371_v21, %v277_v57  ;;  %v175_v5 = vpop.f32.mrb[11].mxu0 }
 0x109   :  { %v308_v7 = vmul.f32 %v267_v42, %v175_v5 }
 0x10a   :  { %v320_v8 = vpack.c.bf16 %v310_v4, %v309_v3  ;;  %1387 = vmatpush1.bf16.msra.mxu1 %v1706_v43 }
 0x10b   :  { %v319_v28 = vpack.c.bf16 %v308_v7, %v307_v25  ;;  %1380 = vmatprep.subr.bf16.mxu1 %v1712_v44 }
 0x10d   :  { %v1374_v9 = vpop.f32.mrb[12].mxu0  ;;  %484 = vmatmul.mubr.bf16.gmra.mrb[8].mxu1 %v317_v60 }
 0x10e   :  { %v188_v36 = vpop.f32.mrb[13].mxu0  ;;  %493 = vmatprep.mubr.bf16.mxu1 %v1523_v1  ;;  %1388 = vmatpush1.bf16.msra.mxu1 %v1733_v51  ;;  %v1852_v18 = vmul.f32 %v1374_v9, %v292_v10  ;;  %v1862_v51 = vrot.slane %v1831_v16, %v347_v12 }
 0x10f   :  { %v1375_v11 = vpop.f32.mrb[14].mxu0  ;;  %1381 = vmatprep.subr.bf16.mxu1 %v1739_v53  ;;  %v311_v44 = vmul.f32 %v282_v62, %v188_v36 }
 0x110   :  { %v1854_v43 = vmul.f32 %v1375_v11, %v297_v37  ;;  %v191_v20 = vpop.f32.mrb[15].mxu0 }
 0x111   :  { %v312_v22 = vmul.f32 %v287_v6, %v191_v20 }
 0x112   :  { %v322_v23 = vpack.c.bf16 %v1854_v43, %v1852_v18  ;;  %1389 = vmatpush1.bf16.msra.mxu1 %v1757_v58  ;;  %v1457_v18 = vld [vmem:[%s2049_s3 + $0x30] sm:$0xff]  }
 0x113   :  { %v321_v15 = vpack.c.bf16 %v312_v22, %v311_v44  ;;  %1382 = vmatprep.subr.bf16.mxu1 %v1763_v59 }
 0x115   :  { %494 = vmatmul.mubr.bf16.gmra.mrb[12].mxu1 %v318_v56  ;;  %v1865_v53 = vpop.f32.mrb[16].mxu0 }
 0x116   :  { %v752_v24 = vpop.f32.mrb[17].mxu0  ;;  %503 = vmatprep.mubr.bf16.mxu1 %v1523_v1  ;;  %1390 = vmatpush1.bf16.msra.mxu1 %v1775_v63  ;;  %v751_v13 = vadd.f32 %v1865_v53, %v1836_v17 }
 0x117   :  { %v753_v26 = vadd.f32 %v752_v24, %v1862_v51  ;;  %v1870_v27 = vpop.f32.mrb[18].mxu0  ;;  %1383 = vmatprep.subr.bf16.mxu1 %v1781_v0 }
 0x118   :  { %v756_v58 = vpop.f32.mrb[19].mxu0 }
 0x119   :  { %v1233_v29 = vmul.f32 -1.442695, %v753_v26  ;;  %v757_v16 = vadd.f32 %v756_v58, %v1862_v51 }
 0x11a   :  { %1391 = vmatpush1.bf16.msra.mxu1 %v1787_v2 }
 0x11b   :  { %1459 = vpow2.f32 %v1233_v29  ;;  %v1234_v59 = vmul.f32 -1.442695, %v757_v16 }
 0x11d   :  { %1461 = vpow2.f32 %v1234_v59  ;;  %504 = vmatmul.mubr.bf16.gmra.mrb[16].mxu1 %v319_v28  ;;  %v1875_v30 = vpop.f32.mrb[20].mxu0 }
 0x11e   :  { %v762_v31 = vpop.f32.mrb[21].mxu0  ;;  %513 = vmatprep.mubr.bf16.mxu1 %v1523_v1 }
 0x11f   :  { %v763_v63 = vadd.f32 %v762_v31, %v1862_v51  ;;  %v1879_v32 = vpop.f32.mrb[22].mxu0 }
 0x120   :  { %v766_v0 = vpop.f32.mrb[23].mxu0 }
 0x121   :  { %v1235_v33 = vmul.f32 -1.442695, %v763_v63  ;;  %v767_v34 = vadd.f32 %v766_v0, %v1862_v51 }
 0x123   :  { %1463 = vpow2.f32 %v1235_v33  ;;  %v1236_v35 = vmul.f32 -1.442695, %v767_v34  ;;  %v1458_v34 = vld [vmem:[%s2049_s3 + $0x38] sm:$0xff]  }
 0x125   :  { %v1460_v2 = vpop.eup %1459  ;;  %1465 = vpow2.f32 %v1236_v35  ;;  %514 = vmatmul.mubr.bf16.gmra.mrb[20].mxu1 %v320_v8  ;;  %v1882_v38 = vpop.f32.mrb[24].mxu0 }
 0x126   :  { %v877_v39 = vadd.f32 1.0, %v1460_v2  ;;  %v772_v40 = vpop.f32.mrb[25].mxu0  ;;  %523 = vmatprep.mubr.bf16.mxu1 %v1523_v1 }
 0x127   :  { %v1462_v41 = vpop.eup %1461  ;;  %v773_v42 = vadd.f32 %v772_v40, %v1862_v51  ;;  %v1886_v45 = vpop.f32.mrb[26].mxu0 }
 0x128   :  { %1467 = vrcp.f32 %v877_v39  ;;  %v878_v46 = vadd.f32 1.0, %v1462_v41  ;;  %v776_v47 = vpop.f32.mrb[27].mxu0 }
 0x129   :  { %v1237_v48 = vmul.f32 -1.442695, %v773_v42  ;;  %v777_v49 = vadd.f32 %v776_v47, %v1862_v51 }
 0x12a   :  { %1469 = vrcp.f32 %v878_v46 }
 0x12b   :  { %1471 = vpow2.f32 %v1237_v48  ;;  %v1238_v50 = vmul.f32 -1.442695, %v777_v49 }
 0x12d   :  { %v1464_v52 = vpop.eup %1463  ;;  %1473 = vpow2.f32 %v1238_v50  ;;  %524 = vmatmul.mubr.bf16.gmra.mrb[24].mxu1 %v321_v15  ;;  %v1889_v54 = vpop.f32.mrb[28].mxu0 }
 0x12e   :  { %v879_v55 = vadd.f32 1.0, %v1464_v52  ;;  %v782_v56 = vpop.f32.mrb[29].mxu0  ;;  %533 = vmatprep.mubr.bf16.mxu1 %v1523_v1 }
 0x12f   :  { %v1466_v57 = vpop.eup %1465  ;;  %v783_v60 = vadd.f32 %v782_v56, %v1862_v51  ;;  %v1893_v19 = vpop.f32.mrb[30].mxu0 }
 0x130   :  { %1475 = vrcp.f32 %v879_v55  ;;  %v880_v61 = vadd.f32 1.0, %v1466_v57  ;;  %v786_v21 = vpop.f32.mrb[31].mxu0 }
 0x131   :  { %v1239_v62 = vmul.f32 -1.442695, %v783_v60  ;;  %v787_v3 = vadd.f32 %v786_v21, %v1862_v51 }
 0x132   :  { %v1468_v4 = vpop.eup %1467  ;;  %1477 = vrcp.f32 %v880_v61  ;;  %v339_v61 = vld [vmem:[%s2053_s5] sm:$0x3] }
 0x133   :  { %1479 = vpow2.f32 %v1239_v62  ;;  %v1240_v5 = vmul.f32 -1.442695, %v787_v3  ;;  %943 = vperm.xlu0 %1393, %v1468_v4   ;;  %v1924_v21 = vrot.slane %v339_v61, %v343_v14  ;;  %v1928_v62 = vrot.slane %v339_v61, %v347_v12 }
 0x134   :  { %v1470_v6 = vpop.eup %1469 }
 0x135   :  { %v1472_v25 = vpop.eup %1471  ;;  %1481 = vpow2.f32 %v1240_v5  ;;  %v1896_v7 = vpop.f32.mrb[32].mxu0  ;;  %948 = vperm.xlu1 %1394, %v1470_v6   ;;  %534 = vmatmul.mubr.bf16.gmra.mrb[28].mxu1 %v322_v23 }
 0x136   :  { %v881_v8 = vadd.f32 1.0, %v1472_v25  ;;  %v792_v28 = vpop.f32.mrb[33].mxu0  ;;  %808 = vmatprep.mubr.bf16.mxu1 %v1523_v1 }
 0x137   :  { %v1474_v9 = vpop.eup %1473  ;;  %v793_v10 = vadd.f32 %v792_v28, %v1862_v51  ;;  %v1903_v36 = vpop.f32.mrb[34].mxu0 }
 0x138   :  { %1483 = vrcp.f32 %v881_v8  ;;  %v882_v37 = vadd.f32 1.0, %v1474_v9  ;;  %v796_v11 = vpop.f32.mrb[35].mxu0 }
 0x139   :  { %v1241_v20 = vmul.f32 -1.442695, %v793_v10  ;;  %v797_v44 = vadd.f32 %v796_v11, %v1862_v51 }
 0x13a   :  { %v1476_v43 = vpop.eup %1475  ;;  %1485 = vrcp.f32 %v882_v37 }
 0x13b   :  { %1487 = vpow2.f32 %v1241_v20  ;;  %v1242_v22 = vmul.f32 -1.442695, %v797_v44  ;;  %953 = vperm.xlu0 %1393, %v1476_v43  }
 0x13c   :  { %v1478_v23 = vpop.eup %1477 }
 0x13d   :  { %v1480_v15 = vpop.eup %1479  ;;  %1489 = vpow2.f32 %v1242_v22  ;;  %v1909_v24 = vpop.f32.mrb[36].mxu0  ;;  %958 = vperm.xlu1 %1394, %v1478_v23   ;;  %809 = vmatmul.mubr.bf16.vlgmr.msra.gmra.mrb[32].mxu1 %v1457_v18  ;;  %v755_v23 = vadd.f32 %v1870_v27, %v1836_v17  ;;  %v761_v27 = vadd.f32 %v1875_v30, %v1836_v17 }
 0x13e   :  { %v883_v26 = vadd.f32 1.0, %v1480_v15  ;;  %v802_v58 = vpop.f32.mrb[37].mxu0  ;;  %818 = vmatprep.mubr.bf16.mxu1 %v1523_v1 }
 0x13f   :  { %v1482_v29 = vpop.eup %1481  ;;  %v803_v16 = vadd.f32 %v802_v58, %v1862_v51  ;;  %v1913_v59 = vpop.f32.mrb[38].mxu0 }
 0x140   :  { %1491 = vrcp.f32 %v883_v26  ;;  %v884_v31 = vadd.f32 1.0, %v1482_v29  ;;  %v806_v63 = vpop.f32.mrb[39].mxu0 }
 0x141   :  { %v1243_v0 = vmul.f32 -1.442695, %v803_v16  ;;  %v807_v33 = vadd.f32 %v806_v63, %v1862_v51 }
 0x142   :  { %v1484_v35 = vpop.eup %1483  ;;  %1493 = vrcp.f32 %v884_v31 }
 0x143   :  { %1495 = vpow2.f32 %v1243_v0  ;;  %v1244_v2 = vmul.f32 -1.442695, %v807_v33  ;;  %963 = vperm.xlu0 %1393, %v1484_v35  }
 0x144   :  { %v1486_v1 = vpop.eup %1485 }
 0x145   :  { %v1488_v39 = vpop.eup %1487  ;;  %1497 = vpow2.f32 %v1244_v2  ;;  %968 = vperm.xlu1 %1394, %v1486_v1   ;;  %819 = vmatmul.mubr.bf16.gmra.mrb[36].mxu1 %v1458_v34 }
 0x146   :  { %v885_v40 = vadd.f32 1.0, %v1488_v39 }
 0x147   :  { %v1490_v41 = vpop.eup %1489 }
 0x148   :  { %1499 = vrcp.f32 %v885_v40  ;;  %v886_v42 = vadd.f32 1.0, %v1490_v41 }
 0x14a   :  { %v1492_v46 = vpop.eup %1491  ;;  %1501 = vrcp.f32 %v886_v42 }
 0x14b   :  { %973 = vperm.xlu0 %1393, %v1492_v46  }
 0x14c   :  { %v1494_v47 = vpop.eup %1493 }
 0x14d   :  { %v1496_v48 = vpop.eup %1495  ;;  %978 = vperm.xlu1 %1394, %v1494_v47  }
 0x14e   :  { %v887_v49 = vadd.f32 1.0, %v1496_v48  ;;  %v765_v48 = vadd.f32 %v1879_v32, %v1836_v17 }
 0x14f   :  { %v1498_v50 = vpop.eup %1497 }
 0x150   :  { %1503 = vrcp.f32 %v887_v49  ;;  %v888_v52 = vadd.f32 1.0, %v1498_v50 }
 0x152   :  { %v1500_v55 = vpop.eup %1499  ;;  %1505 = vrcp.f32 %v888_v52 }
 0x153   :  { %983 = vperm.xlu0 %1393, %v1500_v55  }
 0x154   :  { %v1502_v56 = vpop.eup %1501 }
 0x155   :  { %988 = vperm.xlu1 %1394, %v1502_v56  }
 0x15a   :  { %v1504_v57 = vpop.eup %1503 }
 0x15b   :  { %993 = vperm.xlu0 %1393, %v1504_v57  }
 0x15c   :  { %v1506_v60 = vpop.eup %1505 }
 0x15d   :  { %998 = vperm.xlu1 %1394, %v1506_v60  }
 0x1b2   :  { %v944_v37 = vpop.permute.xlu0 %943 }
 0x1b4   :  { %v949_v20 = vpop.permute.xlu1 %948 }
 0x1ba   :  { %v954_v34 = vpop.permute.xlu0 %953 }
 0x1bc   :  { %v959_v39 = vpop.permute.xlu1 %958 }
 0x1d0   :  { %v465_v3 = vpop.f32.mrb[0].mxu1 }
 0x1d1   :  { %v466_v4 = vadd.f32 %v465_v3, %v1924_v21  ;;  %v467_v5 = vpop.f32.mrb[1].mxu1 }
 0x1d2   :  { %v468_v6 = vadd.f32 %v467_v5, %v1928_v62  ;;  %v469_v25 = vpop.f32.mrb[2].mxu1 }
 0x1d3   :  { %v470_v8 = vadd.f32 %v469_v25, %v1924_v21  ;;  %v471_v28 = vpop.f32.mrb[3].mxu1 }
 0x1d4   :  { %v925_v9 = vsub.f32 %v466_v4, %v468_v6  ;;  %v472_v10 = vadd.f32 %v471_v28, %v1928_v62 }
 0x1d6   :  { %v1021_v14 = vmul.f32 %v944_v37, %v925_v9  ;;  %v926_v11 = vsub.f32 %v470_v8, %v472_v10  ;;  %v771_v9 = vadd.f32 %v1882_v38, %v1836_v17 }
 0x1d8   :  { %v1037_v12 = vadd.f32 %v1021_v14, %v468_v6  ;;  %v1022_v44 = vmul.f32 %v949_v20, %v926_v11  ;;  %v475_v18 = vpop.f32.mrb[4].mxu1  ;;  %v964_v6 = vpop.permute.xlu0 %963 }
 0x1d9   :  { %v476_v43 = vadd.f32 %v475_v18, %v1924_v21  ;;  %v477_v22 = vpop.f32.mrb[5].mxu1 }
 0x1da   :  { %v1053_v15 = vmax.f32 %v1037_v12, 0.0  ;;  %v1038_v26 = vadd.f32 %v1022_v44, %v472_v10  ;;  %v478_v58 = vadd.f32 %v477_v22, %v1928_v62  ;;  %v479_v29 = vpop.f32.mrb[6].mxu1  ;;  %v969_v10 = vpop.permute.xlu1 %968  ;;  %v775_v12 = vadd.f32 %v1886_v45, %v1836_v17 }
 0x1db   :  { %v480_v16 = vadd.f32 %v479_v29, %v1924_v21  ;;  %v481_v31 = vpop.f32.mrb[7].mxu1 }
 0x1dc   :  { %v1069_v63 = vadd.f32 %v1053_v15, %v751_v13  ;;  %v1054_v0 = vmax.f32 %v1038_v26, 0.0  ;;  %v927_v53 = vsub.f32 %v476_v43, %v478_v58  ;;  %v482_v33 = vadd.f32 %v481_v31, %v1928_v62 }
 0x1de   :  { %v1070_v35 = vadd.f32 %v1054_v0, %v755_v23  ;;  %v1023_v2 = vmul.f32 %v954_v34, %v927_v53  ;;  %v928_v1 = vsub.f32 %v480_v16, %v482_v33  ;;  %v1085_v40 = vmax.f32 %v1069_v63, 0.0  ;;  %v974_v63 = vpop.permute.xlu0 %973 }
 0x1df   :  { %v781_v34 = vadd.f32 %v1889_v54, %v1836_v17 }
 0x1e0   :  { %v1086_v41 = vmax.f32 %v1070_v35, 0.0  ;;  %v1039_v42 = vadd.f32 %v1023_v2, %v478_v58  ;;  %v1024_v46 = vmul.f32 %v959_v39, %v928_v1  ;;  %v485_v47 = vpop.f32.mrb[8].mxu1  ;;  %v979_v35 = vpop.permute.xlu1 %978 }
 0x1e1   :  { %v486_v49 = vadd.f32 %v485_v47, %v1924_v21  ;;  %v487_v50 = vpop.f32.mrb[9].mxu1 }
 0x1e2   :  { %v1284_v52 = vpack.c.bf16 %v1086_v41, %v1085_v40  ;;  %v1055_v55 = vmax.f32 %v1039_v42, 0.0  ;;  %v1040_v56 = vadd.f32 %v1024_v46, %v482_v33  ;;  %v488_v57 = vadd.f32 %v487_v50, %v1928_v62  ;;  %v489_v60 = vpop.f32.mrb[10].mxu1 }
 0x1e3   :  { %v490_v30 = vadd.f32 %v489_v60, %v1924_v21  ;;  %v491_v61 = vpop.f32.mrb[11].mxu1  ;;  %v785_v41 = vadd.f32 %v1893_v19, %v1836_v17 }
 0x1e4   :  { %1285 = vst [vmem:[%s2054_s8] sm:$0xff] %v1284_v52   ;;  %v1071_v3 = vadd.f32 %v1055_v55, %v761_v27  ;;  %v1056_v4 = vmax.f32 %v1040_v56, 0.0  ;;  %v929_v5 = vsub.f32 %v486_v49, %v488_v57  ;;  %v492_v32 = vadd.f32 %v491_v61, %v1928_v62 }
 0x1e6   :  { %v1072_v25 = vadd.f32 %v1056_v4, %v765_v48  ;;  %v1025_v8 = vmul.f32 %v964_v6, %v929_v5  ;;  %v930_v28 = vsub.f32 %v490_v30, %v492_v32  ;;  %v1087_v37 = vmax.f32 %v1071_v3, 0.0  ;;  %v984_v30 = vpop.permute.xlu0 %983 }
 0x1e7   :  { %v791_v5 = vadd.f32 %v1896_v7, %v1836_v17 }
 0x1e8   :  { %v1088_v14 = vmax.f32 %v1072_v25, 0.0  ;;  %v1041_v11 = vadd.f32 %v1025_v8, %v488_v57  ;;  %v1026_v20 = vmul.f32 %v969_v10, %v930_v28  ;;  %v495_v13 = vpop.f32.mrb[12].mxu1  ;;  %v795_v10 = vadd.f32 %v1903_v36, %v1836_v17 }
 0x1e9   :  { %v496_v44 = vadd.f32 %v495_v13, %v1924_v21  ;;  %v497_v18 = vpop.f32.mrb[13].mxu1 }
 0x1ea   :  { %v1289_v43 = vpack.c.bf16 %v1088_v14, %v1087_v37  ;;  %v1057_v22 = vmax.f32 %v1041_v11, 0.0  ;;  %v1042_v23 = vadd.f32 %v1026_v20, %v492_v32  ;;  %v498_v15 = vadd.f32 %v497_v18, %v1928_v62  ;;  %v499_v26 = vpop.f32.mrb[14].mxu1  ;;  %v989_v32 = vpop.permute.xlu1 %988 }
 0x1eb   :  { %v500_v38 = vadd.f32 %v499_v26, %v1924_v21  ;;  %v501_v58 = vpop.f32.mrb[15].mxu1 }
 0x1ec   :  { %1321 = vst [vmem:[%s2054_s8 + $0x8] sm:$0xff] %v1289_v43   ;;  %v1073_v29 = vadd.f32 %v1057_v22, %v771_v9  ;;  %v1058_v16 = vmax.f32 %v1042_v23, 0.0  ;;  %v931_v31 = vsub.f32 %v496_v44, %v498_v15  ;;  %v502_v45 = vadd.f32 %v501_v58, %v1928_v62 }
 0x1ee   :  { %v1074_v0 = vadd.f32 %v1058_v16, %v775_v12  ;;  %v1027_v53 = vmul.f32 %v974_v63, %v931_v31  ;;  %v932_v33 = vsub.f32 %v500_v38, %v502_v45  ;;  %v1089_v2 = vmax.f32 %v1073_v29, 0.0  ;;  %v999_v16 = vpop.permute.xlu1 %998 }
 0x1ef   :  { %v801_v29 = vadd.f32 %v1909_v24, %v1836_v17 }
 0x1f0   :  { %v1090_v1 = vmax.f32 %v1074_v0, 0.0  ;;  %v1043_v27 = vadd.f32 %v1027_v53, %v498_v15  ;;  %v1028_v39 = vmul.f32 %v979_v35, %v932_v33  ;;  %v505_v40 = vpop.f32.mrb[16].mxu1  ;;  %v994_v15 = vpop.permute.xlu0 %993  ;;  %v805_v33 = vadd.f32 %v1913_v59, %v1836_v17 }
 0x1f1   :  { %v506_v42 = vadd.f32 %v505_v40, %v1924_v21  ;;  %v507_v46 = vpop.f32.mrb[17].mxu1 }
 0x1f2   :  { %v1294_v47 = vpack.c.bf16 %v1090_v1, %v1089_v2  ;;  %v1059_v48 = vmax.f32 %v1043_v27, 0.0  ;;  %v1044_v49 = vadd.f32 %v1028_v39, %v502_v45  ;;  %v508_v50 = vadd.f32 %v507_v46, %v1928_v62  ;;  %v509_v52 = vpop.f32.mrb[18].mxu1 }
 0x1f3   :  { %v510_v54 = vadd.f32 %v509_v52, %v1924_v21  ;;  %v511_v55 = vpop.f32.mrb[19].mxu1 }
 0x1f4   :  { %1322 = vst [vmem:[%s2054_s8 + $0x10] sm:$0xff] %v1294_v47   ;;  %v1075_v56 = vadd.f32 %v1059_v48, %v781_v34  ;;  %v1060_v57 = vmax.f32 %v1044_v49, 0.0  ;;  %v933_v60 = vsub.f32 %v506_v42, %v508_v50  ;;  %v512_v19 = vadd.f32 %v511_v55, %v1928_v62 }
 0x1f6   :  { %v1076_v61 = vadd.f32 %v1060_v57, %v785_v41  ;;  %v1029_v3 = vmul.f32 %v984_v30, %v933_v60  ;;  %v934_v4 = vsub.f32 %v510_v54, %v512_v19  ;;  %v1091_v6 = vmax.f32 %v1075_v56, 0.0 }
 0x1f8   :  { %v1092_v25 = vmax.f32 %v1076_v61, 0.0  ;;  %v1045_v8 = vadd.f32 %v1029_v3, %v508_v50  ;;  %v1030_v28 = vmul.f32 %v989_v32, %v934_v4  ;;  %v515_v9 = vpop.f32.mrb[20].mxu1 }
 0x1f9   :  { %v516_v37 = vadd.f32 %v515_v9, %v1924_v21  ;;  %v517_v14 = vpop.f32.mrb[21].mxu1 }
 0x1fa   :  { %v1299_v11 = vpack.c.bf16 %v1092_v25, %v1091_v6  ;;  %v1061_v20 = vmax.f32 %v1045_v8, 0.0  ;;  %v1046_v13 = vadd.f32 %v1030_v28, %v512_v19  ;;  %v518_v12 = vadd.f32 %v517_v14, %v1928_v62  ;;  %v519_v44 = vpop.f32.mrb[22].mxu1 }
 0x1fb   :  { %v520_v7 = vadd.f32 %v519_v44, %v1924_v21  ;;  %v521_v18 = vpop.f32.mrb[23].mxu1 }
 0x1fc   :  { %1323 = vst [vmem:[%s2054_s8 + $0x18] sm:$0xff] %v1299_v11   ;;  %v1077_v43 = vadd.f32 %v1061_v20, %v791_v5  ;;  %v1062_v22 = vmax.f32 %v1046_v13, 0.0  ;;  %v935_v23 = vsub.f32 %v516_v37, %v518_v12  ;;  %v522_v36 = vadd.f32 %v521_v18, %v1928_v62 }
 0x1fe   :  { %v1078_v26 = vadd.f32 %v1062_v22, %v795_v10  ;;  %v1031_v38 = vmul.f32 %v994_v15, %v935_v23  ;;  %v936_v58 = vsub.f32 %v520_v7, %v522_v36  ;;  %v1093_v31 = vmax.f32 %v1077_v43, 0.0 }
 0x200   :  { %v1094_v45 = vmax.f32 %v1078_v26, 0.0  ;;  %v1047_v63 = vadd.f32 %v1031_v38, %v518_v12  ;;  %v1032_v0 = vmul.f32 %v999_v16, %v936_v58  ;;  %v525_v53 = vpop.f32.mrb[24].mxu1 }
 0x201   :  { %v1991_v34 = vadd.f32 %v525_v53, %v1924_v21  ;;  %v527_v35 = vpop.f32.mrb[25].mxu1 }
 0x202   :  { %v1304_v2 = vpack.c.bf16 %v1094_v45, %v1093_v31  ;;  %v1063_v1 = vmax.f32 %v1047_v63, 0.0  ;;  %v1048_v27 = vadd.f32 %v1032_v0, %v522_v36  ;;  %v1994_v39 = vadd.f32 %v527_v35, %v1928_v62  ;;  %v529_v24 = vpop.f32.mrb[26].mxu1 }
 0x203   :  { %v1997_v40 = vadd.f32 %v529_v24, %v1924_v21  ;;  %v531_v41 = vpop.f32.mrb[27].mxu1 }
 0x204   :  { %1324 = vst [vmem:[%s2054_s8 + $0x20] sm:$0xff] %v1304_v2   ;;  %v1079_v59 = vadd.f32 %v1063_v1, %v801_v29  ;;  %v1064_v42 = vmax.f32 %v1048_v27, 0.0  ;;  %v2003_v46 = vadd.f32 %v531_v41, %v1928_v62  ;;  %v937_v47 = vsub.f32 %v1991_v34, %v1994_v39 }
 0x206   :  { %v1080_v48 = vadd.f32 %v1064_v42, %v805_v33  ;;  %v938_v49 = vsub.f32 %v1997_v40, %v2003_v46  ;;  %v1095_v50 = vmax.f32 %v1079_v59, 0.0 }
 0x208   :  { %v1096_v52 = vmax.f32 %v1080_v48, 0.0  ;;  %v535_v54 = vpop.f32.mrb[28].mxu1 }
 0x209   :  { %v2010_v55 = vadd.f32 %v535_v54, %v1924_v21  ;;  %v537_v56 = vpop.f32.mrb[29].mxu1 }
 0x20a   :  { %v1309_v57 = vpack.c.bf16 %v1096_v52, %v1095_v50  ;;  %v2013_v60 = vadd.f32 %v537_v56, %v1928_v62  ;;  %v539_v19 = vpop.f32.mrb[30].mxu1 }
 0x20b   :  { %v2016_v30 = vadd.f32 %v539_v19, %v1924_v21  ;;  %v541_v61 = vpop.f32.mrb[31].mxu1 }
 0x20c   :  { %1325 = vst [vmem:[%s2054_s8 + $0x28] sm:$0xff] %v1309_v57   ;;  %v2022_v3 = vadd.f32 %v541_v61, %v1928_v62  ;;  %v939_v4 = vsub.f32 %v2010_v55, %v2013_v60 }
 0x20e   :  { %v940_v5 = vsub.f32 %v2016_v30, %v2022_v3 }
 0x210   :  { %v810_v32 = vpop.f32.mrb[32].mxu1 }
 0x211   :  { %v812_v6 = vpop.f32.mrb[33].mxu1  ;;  %v811_v53 = vadd.f32 %v810_v32, %v1836_v17 }
 0x212   :  { %v813_v25 = vadd.f32 %v812_v6, %v1862_v51  ;;  %v814_v21 = vpop.f32.mrb[34].mxu1 }
 0x213   :  { %v816_v8 = vpop.f32.mrb[35].mxu1  ;;  %v815_v35 = vadd.f32 %v814_v21, %v1836_v17 }
 0x214   :  { %v1245_v28 = vmul.f32 -1.442695, %v813_v25  ;;  %v817_v9 = vadd.f32 %v816_v8, %v1862_v51 }
 0x216   :  { %1507 = vpow2.f32 %v1245_v28  ;;  %v1246_v10 = vmul.f32 -1.442695, %v817_v9 }
 0x218   :  { %1509 = vpow2.f32 %v1246_v10  ;;  %v820_v62 = vpop.f32.mrb[36].mxu1 }
 0x219   :  { %v822_v37 = vpop.f32.mrb[37].mxu1 }
 0x21a   :  { %v823_v14 = vadd.f32 %v822_v37, %v1862_v51  ;;  %v824_v11 = vpop.f32.mrb[38].mxu1 }
 0x21b   :  { %v826_v20 = vpop.f32.mrb[39].mxu1 }
 0x21c   :  { %v1247_v13 = vmul.f32 -1.442695, %v823_v14  ;;  %v827_v12 = vadd.f32 %v826_v20, %v1862_v51 }
 0x21e   :  { %1511 = vpow2.f32 %v1247_v13  ;;  %v1248_v44 = vmul.f32 -1.442695, %v827_v12 }
 0x220   :  { %v1508_v7 = vpop.eup %1507  ;;  %1513 = vpow2.f32 %v1248_v44 }
 0x221   :  { %v889_v18 = vadd.f32 1.0, %v1508_v7 }
 0x222   :  { %v1510_v43 = vpop.eup %1509 }
 0x223   :  { %1515 = vrcp.f32 %v889_v18  ;;  %v890_v22 = vadd.f32 1.0, %v1510_v43 }
 0x225   :  { %1517 = vrcp.f32 %v890_v22 }
 0x228   :  { %v1512_v23 = vpop.eup %1511 }
 0x229   :  { %v891_v36 = vadd.f32 1.0, %v1512_v23 }
 0x22a   :  { %v1514_v15 = vpop.eup %1513 }
 0x22b   :  { %1519 = vrcp.f32 %v891_v36  ;;  %v892_v26 = vadd.f32 1.0, %v1514_v15 }
 0x22d   :  { %v1516_v38 = vpop.eup %1515  ;;  %1521 = vrcp.f32 %v892_v26 }
 0x22e   :  { %1003 = vperm.xlu0 %1393, %v1516_v38  }
 0x22f   :  { %v1518_v58 = vpop.eup %1517 }
 0x230   :  { %1008 = vperm.xlu1 %1394, %v1518_v58  }
 0x235   :  { %v1520_v51 = vpop.eup %1519 }
 0x236   :  { %1013 = vperm.xlu0 %1393, %v1520_v51  }
 0x237   :  { %v1522_v29 = vpop.eup %1521 }
 0x238   :  { %1018 = vperm.xlu1 %1394, %v1522_v29  }
 0x2ad   :  { %v1004_v16 = vpop.permute.xlu0 %1003 }
 0x2ae   :  { %v1033_v31 = vmul.f32 %v1004_v16, %v937_v47 }
 0x2af   :  { %v1009_v45 = vpop.permute.xlu1 %1008 }
 0x2b0   :  { %v1049_v63 = vadd.f32 %v1033_v31, %v1994_v39  ;;  %v1034_v0 = vmul.f32 %v1009_v45, %v938_v49  ;;  %v821_v39 = vadd.f32 %v820_v62, %v1836_v17 }
 0x2b2   :  { %v1065_v33 = vmax.f32 %v1049_v63, 0.0  ;;  %v1050_v34 = vadd.f32 %v1034_v0, %v2003_v46  ;;  %v825_v46 = vadd.f32 %v824_v11, %v1836_v17 }
 0x2b4   :  { %v1081_v2 = vadd.f32 %v1065_v33, %v811_v53  ;;  %v1066_v1 = vmax.f32 %v1050_v34, 0.0 }
 0x2b5   :  { %v1014_v27 = vpop.permute.xlu0 %1013 }
 0x2b6   :  { %v1082_v24 = vadd.f32 %v1066_v1, %v815_v35  ;;  %v1035_v40 = vmul.f32 %v1014_v27, %v939_v4  ;;  %v1097_v59 = vmax.f32 %v1081_v2, 0.0 }
 0x2b7   :  { %v1019_v41 = vpop.permute.xlu1 %1018 }
 0x2b8   :  { %v1098_v42 = vmax.f32 %v1082_v24, 0.0  ;;  %v1051_v47 = vadd.f32 %v1035_v40, %v2013_v60  ;;  %v1036_v48 = vmul.f32 %v1019_v41, %v940_v5 }
 0x2ba   :  { %v1314_v49 = vpack.c.bf16 %v1098_v42, %v1097_v59  ;;  %v1067_v50 = vmax.f32 %v1051_v47, 0.0  ;;  %v1052_v52 = vadd.f32 %v1036_v48, %v2022_v3 }
 0x2bc   :  { %1326 = vst [vmem:[%s2054_s8 + $0x30] sm:$0xff] %v1314_v49   ;;  %v1083_v54 = vadd.f32 %v1067_v50, %v821_v39  ;;  %v1068_v55 = vmax.f32 %v1052_v52, 0.0 }
 0x2be   :  { %v1084_v56 = vadd.f32 %v1068_v55, %v825_v46  ;;  %v1099_v57 = vmax.f32 %v1083_v54, 0.0 }
 0x2c0   :  { %v1100_v19 = vmax.f32 %v1084_v56, 0.0 }
 0x2c2   :  { %v1319_v30 = vpack.c.bf16 %v1100_v19, %v1099_v57 }
 0x2c4   :  { %1327 = vst [vmem:[%s2054_s8 + $0x38] sm:$0xff] %v1319_v30  }

// kernel: lasage_s_forward.3
= control target key start
LH: loop header
LB: loop body
LE: loop exit
PB: predicated region body
PF: predicated region fallthrough
CT: control target
= control target key end

     0   :  { %v1507_v1 = vmov 0   ;;  %s2030_s2 = inlined_call_operand.vmem [shape: bf16[128,128], index: 2, kind: input, shape index: {}, may-alias: {2,3}]   ;;  %s2031_s0 = inlined_call_operand.vmem [shape: s8[128,128], index: 0, kind: input, shape index: {}]   ;;  %s2032_s6 = inlined_call_operand.vmem [shape: bf16[128,256], index: 6, kind: input, shape index: {}]   ;;  %s2033_s3 = inlined_call_operand.vmem [shape: bf16[128,128], index: 3, kind: input, shape index: {}, may-alias: {2,3}]   ;;  %s2034_s1 = inlined_call_operand.vmem [shape: f32[128,1], index: 1, kind: input, shape index: {}]   ;;  %s2035_s4 = inlined_call_operand.vmem [shape: bf16[128,256], index: 4, kind: input, shape index: {}]   ;;  %s2036_s7 = inlined_call_operand.vmem [shape: f32[1,256], index: 7, kind: input, shape index: {}]   ;;  %s2037_s5 = inlined_call_operand.vmem [shape: f32[1,256], index: 5, kind: input, shape index: {}]   ;;  %s2038_s8 = inlined_call_operand.vmem [shape: bf16[128,128], index: 8, kind: output, shape index: {}]  }
   0x1   :  { %v1379_v0 = vld [vmem:[%s2030_s2] sm:$0xff]   ;;  %1377 = vset.pattern.permute.xlu0 %v1507_v1  ;;  %1378 = vset.pattern.permute.xlu1 %v1507_v1  ;;  %v1380_v2 = vld [vmem:[%s2030_s2 + $0x8] sm:$0xff]   ;;  %v1381_v3 = vld [vmem:[%s2030_s2 + $0x10] sm:$0xff]  }
   0x2   :  { %463 = vmatprep.mubr.bf16.mxu1 %v1507_v1  ;;  %1328 = vmatprep.subr.bf16.mxu0 %v1379_v0  ;;  %v1382_v4 = vld [vmem:[%s2030_s2 + $0x18] sm:$0xff]   ;;  %v30_v5 = vld [vmem:[%s2031_s0] sm:$0xff]  ;;  %v1384_v8 = vld [vmem:[%s2030_s2 + $0x28] sm:$0xff]  }
   0x3   :  { %1329 = vmatpush3.bf16.msra.mxu0 %v1379_v0  ;;  %v34_v6 = vunpack.c.l.s8.bf16 %v30_v5  ;;  %v1383_v7 = vld [vmem:[%s2030_s2 + $0x20] sm:$0xff]   ;;  %v1385_v9 = vld [vmem:[%s2030_s2 + $0x30] sm:$0xff]   ;;  %v1386_v11 = vld [vmem:[%s2030_s2 + $0x38] sm:$0xff]   ;;  %v35_v18 = vunpack.c.h.s8.bf16 %v30_v5 }
   0x4   :  { %1330 = vmatprep.subr.bf16.mxu0 %v1380_v2  ;;  %v203_v10 = vld [vmem:[%s2034_s1] sm:$0xff]  ;;  %v205_v12 = vld [vmem:[%s2034_s1 + $0x10] sm:$0xff]  ;;  %v204_v13 = vld [vmem:[%s2034_s1 + $0x8] sm:$0xff] }
   0x5   :  { %1344 = vmatprep.mubr.bf16.mxu0 %v34_v6  ;;  %221 = vperm.xlu0 %1377, %v203_v10   ;;  %v206_v14 = vld [vmem:[%s2034_s1 + $0x18] sm:$0xff]  ;;  %v1598_v15 = vld [vmem:[%s2032_s6 + $0x4] ss:$8 sps:$4 sm:$0xff]   ;;  %v1609_v19 = vld [vmem:[%s2032_s6] ss:$8 sps:$4 sm:$0xff]  }
   0x6   :  { %231 = vperm.xlu1 %1378, %v205_v12   ;;  %v31_v16 = vld [vmem:[%s2031_s0 + $0x8] sm:$0xff]  ;;  %v207_v17 = vld [vmem:[%s2034_s1 + $0x20] sm:$0xff]  ;;  %v1617_v21 = vld [vmem:[%s2032_s6 + $0x14] ss:$8 sps:$4 sm:$0xff]   ;;  %v341_v12 = vlaneseq }
   0x7   :  { %1331 = vmatpush3.bf16.msra.mxu0 %v1380_v2  ;;  %v208_v20 = vld [vmem:[%s2034_s1 + $0x28] sm:$0xff]  ;;  %v36_v22 = vunpack.c.l.s8.bf16 %v31_v16  ;;  %v209_v23 = vld [vmem:[%s2034_s1 + $0x30] sm:$0xff]  ;;  %v210_v26 = vld [vmem:[%s2034_s1 + $0x38] sm:$0xff]  ;;  %v37_v35 = vunpack.c.h.s8.bf16 %v31_v16 }
   0x8   :  { %1332 = vmatprep.subr.bf16.mxu0 %v1381_v3  ;;  %v1417_v24 = vld [vmem:[%s2035_s4 + $0x4] ss:$8 sps:$4 sm:$0xff]   ;;  %v1629_v25 = vld [vmem:[%s2032_s6 + $0x10] ss:$8 sps:$4 sm:$0xff]   ;;  %v1419_v27 = vld [vmem:[%s2035_s4] ss:$8 sps:$4 sm:$0xff]  }
   0x9   :  { %226 = vperm.xlu0 %1377, %v204_v13   ;;  %v1640_v28 = vld [vmem:[%s2032_s6 + $0x24] ss:$8 sps:$4 sm:$0xff]   ;;  %v32_v29 = vld [vmem:[%s2031_s0 + $0x10] sm:$0xff]  ;;  %431 = vmatprep.subr.bf16.mxu1 %v1417_v24  ;;  %v1666_v36 = vld [vmem:[%s2032_s6 + $0x20] ss:$8 sps:$4 sm:$0xff]   ;;  %v1809_v13 = vshrl.u32 %v341_v12, 7 }
   0xa   :  { %236 = vperm.xlu1 %1378, %v206_v14   ;;  %v1420_v30 = vld [vmem:[%s2035_s4 + $0x14] ss:$8 sps:$4 sm:$0xff]   ;;  %v211_v31 = vld [vmem:[%s2034_s1 + $0x40] sm:$0xff]  ;;  %v1422_v32 = vld [vmem:[%s2035_s4 + $0x10] ss:$8 sps:$4 sm:$0xff]   ;;  %432 = vmatpush1.bf16.msra.mxu1 %v1419_v27  ;;  %v38_v38 = vunpack.c.l.s8.bf16 %v32_v29  ;;  %v39_v48 = vunpack.c.h.s8.bf16 %v32_v29 }
   0xb   :  { %1333 = vmatpush3.bf16.msra.mxu0 %v1381_v3  ;;  %v212_v33 = vld [vmem:[%s2034_s1 + $0x48] sm:$0xff]  ;;  %433 = vmatprep.subr.bf16.mxu1 %v1420_v30  ;;  %v1671_v37 = vld [vmem:[%s2032_s6 + $0x34] ss:$8 sps:$4 sm:$0xff]   ;;  %v1690_v43 = vld [vmem:[%s2032_s6 + $0x30] ss:$8 sps:$4 sm:$0xff]   ;;  %v343_v14 = vsub.s32 0, %v1809_v13 }
   0xc   :  { %1334 = vmatprep.subr.bf16.mxu0 %v1382_v4  ;;  %v1423_v34 = vld [vmem:[%s2035_s4 + $0x24] ss:$8 sps:$4 sm:$0xff]   ;;  %v213_v39 = vld [vmem:[%s2034_s1 + $0x50] sm:$0xff]  ;;  %v1425_v40 = vld [vmem:[%s2035_s4 + $0x20] ss:$8 sps:$4 sm:$0xff]   ;;  %v347_v12 = vsub.s32 1, %v1809_v13 }
   0xd   :  { %241 = vperm.xlu0 %1377, %v207_v17   ;;  %v214_v41 = vld [vmem:[%s2034_s1 + $0x58] sm:$0xff]  ;;  %v1696_v44 = vld [vmem:[%s2032_s6 + $0x44] ss:$8 sps:$4 sm:$0xff]   ;;  %v1717_v51 = vld [vmem:[%s2032_s6 + $0x40] ss:$8 sps:$4 sm:$0xff]  }
   0xe   :  { %246 = vperm.xlu1 %1378, %v208_v20   ;;  %434 = vmatpush1.bf16.msra.mxu1 %v1422_v32  ;;  %v1426_v42 = vld [vmem:[%s2035_s4 + $0x34] ss:$8 sps:$4 sm:$0xff]   ;;  %v215_v46 = vld [vmem:[%s2034_s1 + $0x60] sm:$0xff]  ;;  %v1428_v47 = vld [vmem:[%s2035_s4 + $0x30] ss:$8 sps:$4 sm:$0xff]  }
   0xf   :  { %1335 = vmatpush3.bf16.msra.mxu0 %v1382_v4  ;;  %435 = vmatprep.subr.bf16.mxu1 %v1423_v34  ;;  %v33_v45 = vld [vmem:[%s2031_s0 + $0x18] sm:$0xff]  ;;  %v216_v49 = vld [vmem:[%s2034_s1 + $0x68] sm:$0xff]  ;;  %v217_v54 = vld [vmem:[%s2034_s1 + $0x70] sm:$0xff] }
  0x10   :  { %1336 = vmatprep.subr.bf16.mxu0 %v1383_v7  ;;  %v1429_v50 = vld [vmem:[%s2035_s4 + $0x44] ss:$8 sps:$4 sm:$0xff]   ;;  %v40_v52 = vunpack.c.l.s8.bf16 %v33_v45  ;;  %v1723_v53 = vld [vmem:[%s2032_s6 + $0x54] ss:$8 sps:$4 sm:$0xff]   ;;  %v1431_v55 = vld [vmem:[%s2035_s4 + $0x40] ss:$8 sps:$4 sm:$0xff]   ;;  %v41_v61 = vunpack.c.h.s8.bf16 %v33_v45 }
  0x11   :  { %251 = vperm.xlu0 %1377, %v209_v23   ;;  %v218_v56 = vld [vmem:[%s2034_s1 + $0x78] sm:$0xff]  ;;  %v1747_v59 = vld [vmem:[%s2032_s6 + $0x64] ss:$8 sps:$4 sm:$0xff]   ;;  %v1759_v63 = vld [vmem:[%s2032_s6 + $0x60] ss:$8 sps:$4 sm:$0xff]  }
  0x12   :  { %256 = vperm.xlu1 %1378, %v210_v26   ;;  %436 = vmatpush1.bf16.msra.mxu1 %v1425_v40  ;;  %v1432_v57 = vld [vmem:[%s2035_s4 + $0x54] ss:$8 sps:$4 sm:$0xff]   ;;  %v1741_v58 = vld [vmem:[%s2032_s6 + $0x50] ss:$8 sps:$4 sm:$0xff]   ;;  %v1435_v62 = vld [vmem:[%s2035_s4 + $0x64] ss:$8 sps:$4 sm:$0xff]  }
  0x13   :  { %1337 = vmatpush3.bf16.msra.mxu0 %v1383_v7  ;;  %437 = vmatprep.subr.bf16.mxu1 %v1426_v42  ;;  %v1434_v60 = vld [vmem:[%s2035_s4 + $0x50] ss:$8 sps:$4 sm:$0xff]   ;;  %v1765_v0 = vld [vmem:[%s2032_s6 + $0x74] ss:$8 sps:$4 sm:$0xff]   ;;  %v1411_v3 = vld [vmem:[%s2033_s3] sm:$0xff]  }
  0x14   :  { %1338 = vmatprep.subr.bf16.mxu0 %v1384_v8  ;;  %v1771_v2 = vld [vmem:[%s2032_s6 + $0x70] ss:$8 sps:$4 sm:$0xff]   ;;  %v1412_v4 = vld [vmem:[%s2033_s3 + $0x8] sm:$0xff]   ;;  %v1415_v7 = vld [vmem:[%s2033_s3 + $0x20] sm:$0xff]  }
  0x15   :  { %261 = vperm.xlu0 %1377, %v211_v31   ;;  %v1413_v5 = vld [vmem:[%s2033_s3 + $0x10] sm:$0xff]   ;;  %v1414_v6 = vld [vmem:[%s2033_s3 + $0x18] sm:$0xff]   ;;  %v1815_v16 = vld [vmem:[%s2036_s7] sm:$0x3] }
  0x16   :  { %266 = vperm.xlu1 %1378, %v212_v33   ;;  %438 = vmatpush1.bf16.msra.mxu1 %v1428_v47  ;;  %v1438_v10 = vld [vmem:[%s2035_s4 + $0x74] ss:$8 sps:$4 sm:$0xff]   ;;  %v1820_v17 = vrot.slane %v1815_v16, %v343_v14 }
  0x17   :  { %1339 = vmatpush3.bf16.msra.mxu0 %v1384_v8  ;;  %439 = vmatprep.subr.bf16.mxu1 %v1429_v50  ;;  %v1416_v8 = vld [vmem:[%s2033_s3 + $0x28] sm:$0xff]  }
  0x18   :  { %1340 = vmatprep.subr.bf16.mxu0 %v1385_v9 }
  0x19   :  { %271 = vperm.xlu0 %1377, %v213_v39  }
  0x1a   :  { %276 = vperm.xlu1 %1378, %v214_v41   ;;  %440 = vmatpush1.bf16.msra.mxu1 %v1431_v55 }
  0x1b   :  { %1341 = vmatpush3.bf16.msra.mxu0 %v1385_v9  ;;  %441 = vmatprep.subr.bf16.mxu1 %v1432_v57  ;;  %v1437_v9 = vld [vmem:[%s2035_s4 + $0x60] ss:$8 sps:$4 sm:$0xff]  }
  0x1c   :  { %1342 = vmatprep.subr.bf16.mxu0 %v1386_v11 }
  0x1d   :  { %281 = vperm.xlu0 %1377, %v215_v46  }
  0x1e   :  { %286 = vperm.xlu1 %1378, %v216_v49   ;;  %442 = vmatpush1.bf16.msra.mxu1 %v1434_v60 }
  0x1f   :  { %1343 = vmatpush3.bf16.msra.mxu0 %v1386_v11  ;;  %443 = vmatprep.subr.bf16.mxu1 %v1435_v62  ;;  %v1440_v11 = vld [vmem:[%s2035_s4 + $0x70] ss:$8 sps:$4 sm:$0xff]  }
  0x20   :  { %716 = vmatprep.subr.bf16.mxu0 %v1598_v15 }
  0x21   :  { %291 = vperm.xlu0 %1377, %v217_v54  }
  0x22   :  { %1345 = vmatmul.mubr.bf16.vlgmr.msra.gmra.mrb[0].mxu0 %v35_v18  ;;  %296 = vperm.xlu1 %1378, %v218_v56  }
  0x23   :  { %717 = vmatpush1.bf16.msra.mxu0 %v1609_v19  ;;  %1348 = vmatprep.mubr.bf16.mxu0 %v36_v22 }
  0x24   :  { %718 = vmatprep.subr.bf16.mxu0 %v1617_v21  ;;  %444 = vmatpush1.bf16.msra.mxu1 %v1437_v9 }
  0x25   :  { %445 = vmatprep.subr.bf16.mxu1 %v1438_v10 }
  0x27   :  { %719 = vmatpush1.bf16.msra.mxu0 %v1629_v25 }
  0x28   :  { %720 = vmatprep.subr.bf16.mxu0 %v1640_v28  ;;  %446 = vmatpush1.bf16.msra.mxu1 %v1440_v11 }
  0x29   :  { %1360 = vmatprep.subr.bf16.mxu1 %v1598_v15 }
  0x2a   :  { %1349 = vmatmul.mubr.bf16.gmra.mrb[4].mxu0 %v37_v35 }
  0x2b   :  { %721 = vmatpush1.bf16.msra.mxu0 %v1666_v36  ;;  %1352 = vmatprep.mubr.bf16.mxu0 %v38_v38 }
  0x2c   :  { %722 = vmatprep.subr.bf16.mxu0 %v1671_v37 }
  0x2f   :  { %723 = vmatpush1.bf16.msra.mxu0 %v1690_v43 }
  0x30   :  { %724 = vmatprep.subr.bf16.mxu0 %v1696_v44 }
  0x32   :  { %1353 = vmatmul.mubr.bf16.gmra.mrb[8].mxu0 %v39_v48 }
  0x33   :  { %725 = vmatpush1.bf16.msra.mxu0 %v1717_v51  ;;  %1356 = vmatprep.mubr.bf16.mxu0 %v40_v52 }
  0x34   :  { %726 = vmatprep.subr.bf16.mxu0 %v1723_v53 }
  0x37   :  { %727 = vmatpush1.bf16.msra.mxu0 %v1741_v58 }
  0x38   :  { %728 = vmatprep.subr.bf16.mxu0 %v1747_v59 }
  0x3a   :  { %1357 = vmatmul.mubr.bf16.gmra.mrb[12].mxu0 %v41_v61 }
  0x3b   :  { %729 = vmatpush1.bf16.msra.mxu0 %v1759_v63  ;;  %748 = vmatprep.mubr.bf16.mxu0 %v1507_v1 }
  0x3c   :  { %730 = vmatprep.subr.bf16.mxu0 %v1765_v0 }
  0x3f   :  { %731 = vmatpush1.bf16.msra.mxu0 %v1771_v2 }
  0x42   :  { %749 = vmatmul.mubr.bf16.vlgmr.msra.gmra.mrb[16].mxu0 %v1411_v3 }
  0x43   :  { %758 = vmatprep.mubr.bf16.mxu0 %v1507_v1 }
  0x4a   :  { %759 = vmatmul.mubr.bf16.gmra.mrb[20].mxu0 %v1412_v4 }
  0x4b   :  { %768 = vmatprep.mubr.bf16.mxu0 %v1507_v1 }
  0x52   :  { %769 = vmatmul.mubr.bf16.gmra.mrb[24].mxu0 %v1413_v5 }
  0x53   :  { %778 = vmatprep.mubr.bf16.mxu0 %v1507_v1 }
  0x5a   :  { %779 = vmatmul.mubr.bf16.gmra.mrb[28].mxu0 %v1414_v6 }
  0x5b   :  { %788 = vmatprep.mubr.bf16.mxu0 %v1507_v1 }
  0x62   :  { %789 = vmatmul.mubr.bf16.gmra.mrb[32].mxu0 %v1415_v7 }
  0x63   :  { %798 = vmatprep.mubr.bf16.mxu0 %v1507_v1 }
  0x6a   :  { %799 = vmatmul.mubr.bf16.gmra.mrb[36].mxu0 %v1416_v8 }
  0x84   :  { %v222_v18 = vpop.permute.xlu0 %221 }
  0x85   :  { %v232_v20 = vpop.permute.xlu1 %231 }
  0x88   :  { %v227_v22 = vpop.permute.xlu0 %226 }
  0x89   :  { %v237_v23 = vpop.permute.xlu1 %236 }
  0x8c   :  { %v242_v15 = vpop.permute.xlu0 %241 }
  0x8d   :  { %v247_v24 = vpop.permute.xlu1 %246 }
  0x90   :  { %v252_v27 = vpop.permute.xlu0 %251 }
  0x91   :  { %v257_v30 = vpop.permute.xlu1 %256 }
  0x94   :  { %v262_v41 = vpop.permute.xlu0 %261 }
  0x95   :  { %v267_v42 = vpop.permute.xlu1 %266 }
  0x98   :  { %v272_v55 = vpop.permute.xlu0 %271 }
  0x99   :  { %v277_v57 = vpop.permute.xlu1 %276 }
  0x9c   :  { %v282_v62 = vpop.permute.xlu0 %281 }
  0x9d   :  { %v287_v6 = vpop.permute.xlu1 %286 }
  0xa0   :  { %v292_v10 = vpop.permute.xlu0 %291 }
  0xf5   :  { %v1346_v26 = vpop.f32.mrb[0].mxu0 }
  0xf6   :  { %v140_v29 = vpop.f32.mrb[1].mxu0  ;;  %v301_v32 = vmul.f32 %v1346_v26, %v232_v20 }
  0xf7   :  { %v1347_v31 = vpop.f32.mrb[2].mxu0  ;;  %v299_v35 = vmul.f32 %v222_v18, %v140_v29 }
  0xf8   :  { %v302_v33 = vmul.f32 %v1347_v31, %v237_v23  ;;  %v143_v34 = vpop.f32.mrb[3].mxu0 }
  0xf9   :  { %v300_v38 = vmul.f32 %v227_v22, %v143_v34 }
  0xfa   :  { %v316_v39 = vpack.c.bf16 %v302_v33, %v301_v32 }
  0xfb   :  { %v315_v40 = vpack.c.bf16 %v300_v38, %v299_v35 }
  0xfd   :  { %v1350_v45 = vpop.f32.mrb[4].mxu0  ;;  %464 = vmatmul.mubr.bf16.vlgmr.msra.gmra.mrb[0].mxu1 %v315_v40 }
  0xfe   :  { %1368 = vmatpush1.bf16.msra.mxu1 %v1609_v19  ;;  %v156_v46 = vpop.f32.mrb[5].mxu0  ;;  %473 = vmatprep.mubr.bf16.mxu1 %v1507_v1  ;;  %v305_v48 = vmul.f32 %v1350_v45, %v252_v27 }
  0xff   :  { %v1351_v47 = vpop.f32.mrb[6].mxu0  ;;  %1361 = vmatprep.subr.bf16.mxu1 %v1617_v21  ;;  %v303_v52 = vmul.f32 %v242_v15, %v156_v46 }
 0x100   :  { %v306_v49 = vmul.f32 %v1351_v47, %v257_v30  ;;  %v159_v50 = vpop.f32.mrb[7].mxu0 }
 0x101   :  { %v304_v54 = vmul.f32 %v247_v24, %v159_v50 }
 0x102   :  { %v318_v56 = vpack.c.bf16 %v306_v49, %v305_v48  ;;  %1369 = vmatpush1.bf16.msra.mxu1 %v1629_v25 }
 0x103   :  { %v317_v60 = vpack.c.bf16 %v304_v54, %v303_v52  ;;  %1362 = vmatprep.subr.bf16.mxu1 %v1640_v28 }
 0x105   :  { %v1354_v19 = vpop.f32.mrb[8].mxu0  ;;  %474 = vmatmul.mubr.bf16.gmra.mrb[4].mxu1 %v316_v39 }
 0x106   :  { %v172_v61 = vpop.f32.mrb[9].mxu0  ;;  %483 = vmatprep.mubr.bf16.mxu1 %v1507_v1  ;;  %1370 = vmatpush1.bf16.msra.mxu1 %v1666_v36  ;;  %v309_v3 = vmul.f32 %v1354_v19, %v272_v55 }
 0x107   :  { %v1355_v21 = vpop.f32.mrb[10].mxu0  ;;  %1363 = vmatprep.subr.bf16.mxu1 %v1671_v37  ;;  %v307_v25 = vmul.f32 %v262_v41, %v172_v61  ;;  %v297_v37 = vpop.permute.xlu1 %296 }
 0x108   :  { %v310_v4 = vmul.f32 %v1355_v21, %v277_v57  ;;  %v175_v5 = vpop.f32.mrb[11].mxu0 }
 0x109   :  { %v308_v7 = vmul.f32 %v267_v42, %v175_v5 }
 0x10a   :  { %v320_v8 = vpack.c.bf16 %v310_v4, %v309_v3  ;;  %1371 = vmatpush1.bf16.msra.mxu1 %v1690_v43 }
 0x10b   :  { %v319_v28 = vpack.c.bf16 %v308_v7, %v307_v25  ;;  %1364 = vmatprep.subr.bf16.mxu1 %v1696_v44 }
 0x10d   :  { %v1358_v9 = vpop.f32.mrb[12].mxu0  ;;  %484 = vmatmul.mubr.bf16.gmra.mrb[8].mxu1 %v317_v60 }
 0x10e   :  { %v188_v36 = vpop.f32.mrb[13].mxu0  ;;  %493 = vmatprep.mubr.bf16.mxu1 %v1507_v1  ;;  %1372 = vmatpush1.bf16.msra.mxu1 %v1717_v51  ;;  %v1836_v18 = vmul.f32 %v1358_v9, %v292_v10  ;;  %v1846_v51 = vrot.slane %v1815_v16, %v347_v12 }
 0x10f   :  { %v1359_v11 = vpop.f32.mrb[14].mxu0  ;;  %1365 = vmatprep.subr.bf16.mxu1 %v1723_v53  ;;  %v311_v44 = vmul.f32 %v282_v62, %v188_v36 }
 0x110   :  { %v1838_v43 = vmul.f32 %v1359_v11, %v297_v37  ;;  %v191_v20 = vpop.f32.mrb[15].mxu0 }
 0x111   :  { %v312_v22 = vmul.f32 %v287_v6, %v191_v20 }
 0x112   :  { %v322_v23 = vpack.c.bf16 %v1838_v43, %v1836_v18  ;;  %1373 = vmatpush1.bf16.msra.mxu1 %v1741_v58  ;;  %v1441_v18 = vld [vmem:[%s2033_s3 + $0x30] sm:$0xff]  }
 0x113   :  { %v321_v15 = vpack.c.bf16 %v312_v22, %v311_v44  ;;  %1366 = vmatprep.subr.bf16.mxu1 %v1747_v59 }
 0x115   :  { %494 = vmatmul.mubr.bf16.gmra.mrb[12].mxu1 %v318_v56  ;;  %v1849_v53 = vpop.f32.mrb[16].mxu0 }
 0x116   :  { %v752_v24 = vpop.f32.mrb[17].mxu0  ;;  %503 = vmatprep.mubr.bf16.mxu1 %v1507_v1  ;;  %1374 = vmatpush1.bf16.msra.mxu1 %v1759_v63  ;;  %v751_v13 = vadd.f32 %v1849_v53, %v1820_v17 }
 0x117   :  { %v753_v26 = vadd.f32 %v752_v24, %v1846_v51  ;;  %v1854_v27 = vpop.f32.mrb[18].mxu0  ;;  %1367 = vmatprep.subr.bf16.mxu1 %v1765_v0 }
 0x118   :  { %v756_v58 = vpop.f32.mrb[19].mxu0 }
 0x119   :  { %v1217_v29 = vmul.f32 -1.442695, %v753_v26  ;;  %v757_v16 = vadd.f32 %v756_v58, %v1846_v51 }
 0x11a   :  { %1375 = vmatpush1.bf16.msra.mxu1 %v1771_v2 }
 0x11b   :  { %1443 = vpow2.f32 %v1217_v29  ;;  %v1218_v59 = vmul.f32 -1.442695, %v757_v16 }
 0x11d   :  { %1445 = vpow2.f32 %v1218_v59  ;;  %504 = vmatmul.mubr.bf16.gmra.mrb[16].mxu1 %v319_v28  ;;  %v1859_v30 = vpop.f32.mrb[20].mxu0 }
 0x11e   :  { %v762_v31 = vpop.f32.mrb[21].mxu0  ;;  %513 = vmatprep.mubr.bf16.mxu1 %v1507_v1 }
 0x11f   :  { %v763_v63 = vadd.f32 %v762_v31, %v1846_v51  ;;  %v1863_v32 = vpop.f32.mrb[22].mxu0 }
 0x120   :  { %v766_v0 = vpop.f32.mrb[23].mxu0 }
 0x121   :  { %v1219_v33 = vmul.f32 -1.442695, %v763_v63  ;;  %v767_v34 = vadd.f32 %v766_v0, %v1846_v51 }
 0x123   :  { %1447 = vpow2.f32 %v1219_v33  ;;  %v1220_v35 = vmul.f32 -1.442695, %v767_v34  ;;  %v1442_v34 = vld [vmem:[%s2033_s3 + $0x38] sm:$0xff]  }
 0x125   :  { %v1444_v2 = vpop.eup %1443  ;;  %1449 = vpow2.f32 %v1220_v35  ;;  %514 = vmatmul.mubr.bf16.gmra.mrb[20].mxu1 %v320_v8  ;;  %v1866_v38 = vpop.f32.mrb[24].mxu0 }
 0x126   :  { %v877_v39 = vadd.f32 1.0, %v1444_v2  ;;  %v772_v40 = vpop.f32.mrb[25].mxu0  ;;  %523 = vmatprep.mubr.bf16.mxu1 %v1507_v1 }
 0x127   :  { %v1446_v41 = vpop.eup %1445  ;;  %v773_v42 = vadd.f32 %v772_v40, %v1846_v51  ;;  %v1870_v45 = vpop.f32.mrb[26].mxu0 }
 0x128   :  { %1451 = vrcp.f32 %v877_v39  ;;  %v878_v46 = vadd.f32 1.0, %v1446_v41  ;;  %v776_v47 = vpop.f32.mrb[27].mxu0 }
 0x129   :  { %v1221_v48 = vmul.f32 -1.442695, %v773_v42  ;;  %v777_v49 = vadd.f32 %v776_v47, %v1846_v51 }
 0x12a   :  { %1453 = vrcp.f32 %v878_v46 }
 0x12b   :  { %1455 = vpow2.f32 %v1221_v48  ;;  %v1222_v50 = vmul.f32 -1.442695, %v777_v49 }
 0x12d   :  { %v1448_v52 = vpop.eup %1447  ;;  %1457 = vpow2.f32 %v1222_v50  ;;  %524 = vmatmul.mubr.bf16.gmra.mrb[24].mxu1 %v321_v15  ;;  %v1873_v54 = vpop.f32.mrb[28].mxu0 }
 0x12e   :  { %v879_v55 = vadd.f32 1.0, %v1448_v52  ;;  %v782_v56 = vpop.f32.mrb[29].mxu0  ;;  %533 = vmatprep.mubr.bf16.mxu1 %v1507_v1 }
 0x12f   :  { %v1450_v57 = vpop.eup %1449  ;;  %v783_v60 = vadd.f32 %v782_v56, %v1846_v51  ;;  %v1877_v19 = vpop.f32.mrb[30].mxu0 }
 0x130   :  { %1459 = vrcp.f32 %v879_v55  ;;  %v880_v61 = vadd.f32 1.0, %v1450_v57  ;;  %v786_v21 = vpop.f32.mrb[31].mxu0 }
 0x131   :  { %v1223_v62 = vmul.f32 -1.442695, %v783_v60  ;;  %v787_v3 = vadd.f32 %v786_v21, %v1846_v51 }
 0x132   :  { %v1452_v4 = vpop.eup %1451  ;;  %1461 = vrcp.f32 %v880_v61  ;;  %v339_v61 = vld [vmem:[%s2037_s5] sm:$0x3] }
 0x133   :  { %1463 = vpow2.f32 %v1223_v62  ;;  %v1224_v5 = vmul.f32 -1.442695, %v787_v3  ;;  %943 = vperm.xlu0 %1377, %v1452_v4   ;;  %v1908_v21 = vrot.slane %v339_v61, %v343_v14  ;;  %v1912_v62 = vrot.slane %v339_v61, %v347_v12 }
 0x134   :  { %v1454_v6 = vpop.eup %1453 }
 0x135   :  { %v1456_v25 = vpop.eup %1455  ;;  %1465 = vpow2.f32 %v1224_v5  ;;  %v1880_v7 = vpop.f32.mrb[32].mxu0  ;;  %948 = vperm.xlu1 %1378, %v1454_v6   ;;  %534 = vmatmul.mubr.bf16.gmra.mrb[28].mxu1 %v322_v23 }
 0x136   :  { %v881_v8 = vadd.f32 1.0, %v1456_v25  ;;  %v792_v28 = vpop.f32.mrb[33].mxu0  ;;  %808 = vmatprep.mubr.bf16.mxu1 %v1507_v1 }
 0x137   :  { %v1458_v9 = vpop.eup %1457  ;;  %v793_v10 = vadd.f32 %v792_v28, %v1846_v51  ;;  %v1887_v36 = vpop.f32.mrb[34].mxu0 }
 0x138   :  { %1467 = vrcp.f32 %v881_v8  ;;  %v882_v37 = vadd.f32 1.0, %v1458_v9  ;;  %v796_v11 = vpop.f32.mrb[35].mxu0 }
 0x139   :  { %v1225_v20 = vmul.f32 -1.442695, %v793_v10  ;;  %v797_v44 = vadd.f32 %v796_v11, %v1846_v51 }
 0x13a   :  { %v1460_v43 = vpop.eup %1459  ;;  %1469 = vrcp.f32 %v882_v37 }
 0x13b   :  { %1471 = vpow2.f32 %v1225_v20  ;;  %v1226_v22 = vmul.f32 -1.442695, %v797_v44  ;;  %953 = vperm.xlu0 %1377, %v1460_v43  }
 0x13c   :  { %v1462_v23 = vpop.eup %1461 }
 0x13d   :  { %v1464_v15 = vpop.eup %1463  ;;  %1473 = vpow2.f32 %v1226_v22  ;;  %v1893_v24 = vpop.f32.mrb[36].mxu0  ;;  %958 = vperm.xlu1 %1378, %v1462_v23   ;;  %809 = vmatmul.mubr.bf16.vlgmr.msra.gmra.mrb[32].mxu1 %v1441_v18  ;;  %v755_v23 = vadd.f32 %v1854_v27, %v1820_v17  ;;  %v761_v27 = vadd.f32 %v1859_v30, %v1820_v17 }
 0x13e   :  { %v883_v26 = vadd.f32 1.0, %v1464_v15  ;;  %v802_v58 = vpop.f32.mrb[37].mxu0  ;;  %818 = vmatprep.mubr.bf16.mxu1 %v1507_v1 }
 0x13f   :  { %v1466_v29 = vpop.eup %1465  ;;  %v803_v16 = vadd.f32 %v802_v58, %v1846_v51  ;;  %v1897_v59 = vpop.f32.mrb[38].mxu0 }
 0x140   :  { %1475 = vrcp.f32 %v883_v26  ;;  %v884_v31 = vadd.f32 1.0, %v1466_v29  ;;  %v806_v63 = vpop.f32.mrb[39].mxu0 }
 0x141   :  { %v1227_v0 = vmul.f32 -1.442695, %v803_v16  ;;  %v807_v33 = vadd.f32 %v806_v63, %v1846_v51 }
 0x142   :  { %v1468_v35 = vpop.eup %1467  ;;  %1477 = vrcp.f32 %v884_v31 }
 0x143   :  { %1479 = vpow2.f32 %v1227_v0  ;;  %v1228_v2 = vmul.f32 -1.442695, %v807_v33  ;;  %963 = vperm.xlu0 %1377, %v1468_v35  }
 0x144   :  { %v1470_v1 = vpop.eup %1469 }
 0x145   :  { %v1472_v39 = vpop.eup %1471  ;;  %1481 = vpow2.f32 %v1228_v2  ;;  %968 = vperm.xlu1 %1378, %v1470_v1   ;;  %819 = vmatmul.mubr.bf16.gmra.mrb[36].mxu1 %v1442_v34 }
 0x146   :  { %v885_v40 = vadd.f32 1.0, %v1472_v39 }
 0x147   :  { %v1474_v41 = vpop.eup %1473 }
 0x148   :  { %1483 = vrcp.f32 %v885_v40  ;;  %v886_v42 = vadd.f32 1.0, %v1474_v41 }
 0x14a   :  { %v1476_v46 = vpop.eup %1475  ;;  %1485 = vrcp.f32 %v886_v42 }
 0x14b   :  { %973 = vperm.xlu0 %1377, %v1476_v46  }
 0x14c   :  { %v1478_v47 = vpop.eup %1477 }
 0x14d   :  { %v1480_v48 = vpop.eup %1479  ;;  %978 = vperm.xlu1 %1378, %v1478_v47  }
 0x14e   :  { %v887_v49 = vadd.f32 1.0, %v1480_v48 }
 0x14f   :  { %v1482_v50 = vpop.eup %1481 }
 0x150   :  { %1487 = vrcp.f32 %v887_v49  ;;  %v888_v52 = vadd.f32 1.0, %v1482_v50  ;;  %v765_v49 = vadd.f32 %v1863_v32, %v1820_v17 }
 0x152   :  { %v1484_v55 = vpop.eup %1483  ;;  %1489 = vrcp.f32 %v888_v52 }
 0x153   :  { %983 = vperm.xlu0 %1377, %v1484_v55  }
 0x154   :  { %v1486_v56 = vpop.eup %1485 }
 0x155   :  { %988 = vperm.xlu1 %1378, %v1486_v56  }
 0x15a   :  { %v1488_v57 = vpop.eup %1487 }
 0x15b   :  { %993 = vperm.xlu0 %1377, %v1488_v57  }
 0x15c   :  { %v1490_v60 = vpop.eup %1489 }
 0x15d   :  { %998 = vperm.xlu1 %1378, %v1490_v60  }
 0x1b2   :  { %v944_v37 = vpop.permute.xlu0 %943 }
 0x1b4   :  { %v949_v20 = vpop.permute.xlu1 %948 }
 0x1ba   :  { %v954_v34 = vpop.permute.xlu0 %953 }
 0x1bc   :  { %v959_v39 = vpop.permute.xlu1 %958 }
 0x1d0   :  { %v465_v3 = vpop.f32.mrb[0].mxu1 }
 0x1d1   :  { %v466_v4 = vadd.f32 %v465_v3, %v1908_v21  ;;  %v467_v5 = vpop.f32.mrb[1].mxu1 }
 0x1d2   :  { %v468_v6 = vadd.f32 %v467_v5, %v1912_v62  ;;  %v469_v25 = vpop.f32.mrb[2].mxu1  ;;  %v964_v5 = vpop.permute.xlu0 %963 }
 0x1d3   :  { %v470_v8 = vadd.f32 %v469_v25, %v1908_v21  ;;  %v471_v28 = vpop.f32.mrb[3].mxu1 }
 0x1d4   :  { %v925_v9 = vsub.f32 %v466_v4, %v468_v6  ;;  %v472_v10 = vadd.f32 %v471_v28, %v1912_v62  ;;  %v771_v28 = vadd.f32 %v1866_v38, %v1820_v17 }
 0x1d6   :  { %v1021_v14 = vmul.f32 %v944_v37, %v925_v9  ;;  %v926_v11 = vsub.f32 %v470_v8, %v472_v10  ;;  %v969_v8 = vpop.permute.xlu1 %968 }
 0x1d8   :  { %v1037_v12 = vadd.f32 %v1021_v14, %v468_v6  ;;  %v1022_v44 = vmul.f32 %v949_v20, %v926_v11  ;;  %v475_v18 = vpop.f32.mrb[4].mxu1 }
 0x1d9   :  { %v476_v43 = vadd.f32 %v475_v18, %v1908_v21  ;;  %v477_v22 = vpop.f32.mrb[5].mxu1 }
 0x1da   :  { %v1053_v15 = vmax.f32 %v1037_v12, 0.0  ;;  %v1038_v26 = vadd.f32 %v1022_v44, %v472_v10  ;;  %v478_v58 = vadd.f32 %v477_v22, %v1912_v62  ;;  %v479_v29 = vpop.f32.mrb[6].mxu1 }
 0x1db   :  { %v480_v16 = vadd.f32 %v479_v29, %v1908_v21  ;;  %v481_v31 = vpop.f32.mrb[7].mxu1  ;;  %v974_v29 = vpop.permute.xlu0 %973 }
 0x1dc   :  { %v1069_v63 = vadd.f32 %v1053_v15, %v751_v13  ;;  %v1054_v0 = vmax.f32 %v1038_v26, 0.0  ;;  %v927_v53 = vsub.f32 %v476_v43, %v478_v58  ;;  %v482_v33 = vadd.f32 %v481_v31, %v1912_v62 }
 0x1dd   :  { %v775_v13 = vadd.f32 %v1870_v45, %v1820_v17 }
 0x1de   :  { %v1070_v35 = vadd.f32 %v1054_v0, %v755_v23  ;;  %v1023_v2 = vmul.f32 %v954_v34, %v927_v53  ;;  %v928_v1 = vsub.f32 %v480_v16, %v482_v33  ;;  %v781_v0 = vadd.f32 %v1873_v54, %v1820_v17 }
 0x1e0   :  { %v1268_v40 = vpack.c.bf16 %v1070_v35, %v1069_v63  ;;  %v1039_v41 = vadd.f32 %v1023_v2, %v478_v58  ;;  %v1024_v42 = vmul.f32 %v959_v39, %v928_v1  ;;  %v485_v46 = vpop.f32.mrb[8].mxu1  ;;  %v979_v63 = vpop.permute.xlu1 %978  ;;  %v785_v39 = vadd.f32 %v1877_v19, %v1820_v17 }
 0x1e1   :  { %v486_v47 = vadd.f32 %v485_v46, %v1908_v21  ;;  %v487_v48 = vpop.f32.mrb[9].mxu1 }
 0x1e2   :  { %1269 = vst [vmem:[%s2038_s8] sm:$0xff] %v1268_v40   ;;  %v1055_v50 = vmax.f32 %v1039_v41, 0.0  ;;  %v1040_v52 = vadd.f32 %v1024_v42, %v482_v33  ;;  %v488_v55 = vadd.f32 %v487_v48, %v1912_v62  ;;  %v489_v56 = vpop.f32.mrb[10].mxu1 }
 0x1e3   :  { %v490_v30 = vadd.f32 %v489_v56, %v1908_v21  ;;  %v491_v57 = vpop.f32.mrb[11].mxu1 }
 0x1e4   :  { %v1071_v60 = vadd.f32 %v1055_v50, %v761_v27  ;;  %v1056_v61 = vmax.f32 %v1040_v52, 0.0  ;;  %v929_v3 = vsub.f32 %v486_v47, %v488_v55  ;;  %v492_v4 = vadd.f32 %v491_v57, %v1912_v62  ;;  %v984_v52 = vpop.permute.xlu0 %983 }
 0x1e5   :  { %v791_v57 = vadd.f32 %v1880_v7, %v1820_v17 }
 0x1e6   :  { %v1072_v6 = vadd.f32 %v1056_v61, %v765_v49  ;;  %v1025_v32 = vmul.f32 %v964_v5, %v929_v3  ;;  %v930_v25 = vsub.f32 %v490_v30, %v492_v4  ;;  %v989_v30 = vpop.permute.xlu1 %988 }
 0x1e8   :  { %v1273_v9 = vpack.c.bf16 %v1072_v6, %v1071_v60  ;;  %v1041_v10 = vadd.f32 %v1025_v32, %v488_v55  ;;  %v1026_v37 = vmul.f32 %v969_v8, %v930_v25  ;;  %v495_v14 = vpop.f32.mrb[12].mxu1  ;;  %v795_v32 = vadd.f32 %v1887_v36, %v1820_v17 }
 0x1e9   :  { %v496_v11 = vadd.f32 %v495_v14, %v1908_v21  ;;  %v497_v20 = vpop.f32.mrb[13].mxu1 }
 0x1ea   :  { %1305 = vst [vmem:[%s2038_s8 + $0x8] sm:$0xff] %v1273_v9   ;;  %v1057_v12 = vmax.f32 %v1041_v10, 0.0  ;;  %v1042_v44 = vadd.f32 %v1026_v37, %v492_v4  ;;  %v498_v18 = vadd.f32 %v497_v20, %v1912_v62  ;;  %v499_v43 = vpop.f32.mrb[14].mxu1 }
 0x1eb   :  { %v500_v38 = vadd.f32 %v499_v43, %v1908_v21  ;;  %v501_v22 = vpop.f32.mrb[15].mxu1  ;;  %v801_v43 = vadd.f32 %v1893_v24, %v1820_v17 }
 0x1ec   :  { %v1073_v23 = vadd.f32 %v1057_v12, %v771_v28  ;;  %v1058_v15 = vmax.f32 %v1042_v44, 0.0  ;;  %v931_v26 = vsub.f32 %v496_v11, %v498_v18  ;;  %v502_v58 = vadd.f32 %v501_v22, %v1912_v62 }
 0x1ee   :  { %v1074_v16 = vadd.f32 %v1058_v15, %v775_v13  ;;  %v1027_v45 = vmul.f32 %v974_v29, %v931_v26  ;;  %v932_v31 = vsub.f32 %v500_v38, %v502_v58  ;;  %v994_v13 = vpop.permute.xlu0 %993  ;;  %v805_v29 = vadd.f32 %v1897_v59, %v1820_v17 }
 0x1f0   :  { %v1278_v53 = vpack.c.bf16 %v1074_v16, %v1073_v23  ;;  %v1043_v33 = vadd.f32 %v1027_v45, %v498_v18  ;;  %v1028_v34 = vmul.f32 %v979_v63, %v932_v31  ;;  %v505_v35 = vpop.f32.mrb[16].mxu1  ;;  %v999_v18 = vpop.permute.xlu1 %998 }
 0x1f1   :  { %v506_v2 = vadd.f32 %v505_v35, %v1908_v21  ;;  %v507_v1 = vpop.f32.mrb[17].mxu1 }
 0x1f2   :  { %1306 = vst [vmem:[%s2038_s8 + $0x10] sm:$0xff] %v1278_v53   ;;  %v1059_v27 = vmax.f32 %v1043_v33, 0.0  ;;  %v1044_v40 = vadd.f32 %v1028_v34, %v502_v58  ;;  %v508_v41 = vadd.f32 %v507_v1, %v1912_v62  ;;  %v509_v42 = vpop.f32.mrb[18].mxu1 }
 0x1f3   :  { %v510_v54 = vadd.f32 %v509_v42, %v1908_v21  ;;  %v511_v46 = vpop.f32.mrb[19].mxu1 }
 0x1f4   :  { %v1075_v47 = vadd.f32 %v1059_v27, %v781_v0  ;;  %v1060_v48 = vmax.f32 %v1044_v40, 0.0  ;;  %v933_v49 = vsub.f32 %v506_v2, %v508_v41  ;;  %v512_v50 = vadd.f32 %v511_v46, %v1912_v62 }
 0x1f6   :  { %v1076_v55 = vadd.f32 %v1060_v48, %v785_v39  ;;  %v1029_v19 = vmul.f32 %v984_v52, %v933_v49  ;;  %v934_v56 = vsub.f32 %v510_v54, %v512_v50 }
 0x1f8   :  { %v1283_v60 = vpack.c.bf16 %v1076_v55, %v1075_v47  ;;  %v1045_v61 = vadd.f32 %v1029_v19, %v508_v41  ;;  %v1030_v3 = vmul.f32 %v989_v30, %v934_v56  ;;  %v515_v4 = vpop.f32.mrb[20].mxu1 }
 0x1f9   :  { %v516_v5 = vadd.f32 %v515_v4, %v1908_v21  ;;  %v517_v6 = vpop.f32.mrb[21].mxu1 }
 0x1fa   :  { %1307 = vst [vmem:[%s2038_s8 + $0x18] sm:$0xff] %v1283_v60   ;;  %v1061_v25 = vmax.f32 %v1045_v61, 0.0  ;;  %v1046_v8 = vadd.f32 %v1030_v3, %v512_v50  ;;  %v518_v28 = vadd.f32 %v517_v6, %v1912_v62  ;;  %v519_v9 = vpop.f32.mrb[22].mxu1 }
 0x1fb   :  { %v520_v7 = vadd.f32 %v519_v9, %v1908_v21  ;;  %v521_v10 = vpop.f32.mrb[23].mxu1 }
 0x1fc   :  { %v1077_v37 = vadd.f32 %v1061_v25, %v791_v57  ;;  %v1062_v14 = vmax.f32 %v1046_v8, 0.0  ;;  %v935_v11 = vsub.f32 %v516_v5, %v518_v28  ;;  %v522_v20 = vadd.f32 %v521_v10, %v1912_v62 }
 0x1fe   :  { %v1078_v12 = vadd.f32 %v1062_v14, %v795_v32  ;;  %v1031_v36 = vmul.f32 %v994_v13, %v935_v11  ;;  %v936_v44 = vsub.f32 %v520_v7, %v522_v20 }
 0x200   :  { %v1288_v38 = vpack.c.bf16 %v1078_v12, %v1077_v37  ;;  %v1047_v22 = vadd.f32 %v1031_v36, %v518_v28  ;;  %v1032_v23 = vmul.f32 %v999_v18, %v936_v44  ;;  %v525_v15 = vpop.f32.mrb[24].mxu1 }
 0x201   :  { %v1973_v26 = vadd.f32 %v525_v15, %v1908_v21  ;;  %v527_v58 = vpop.f32.mrb[25].mxu1 }
 0x202   :  { %1308 = vst [vmem:[%s2038_s8 + $0x20] sm:$0xff] %v1288_v38   ;;  %v1063_v16 = vmax.f32 %v1047_v22, 0.0  ;;  %v1048_v45 = vadd.f32 %v1032_v23, %v522_v20  ;;  %v1981_v31 = vadd.f32 %v527_v58, %v1912_v62  ;;  %v529_v24 = vpop.f32.mrb[26].mxu1 }
 0x203   :  { %v1984_v63 = vadd.f32 %v529_v24, %v1908_v21  ;;  %v531_v0 = vpop.f32.mrb[27].mxu1 }
 0x204   :  { %v1079_v53 = vadd.f32 %v1063_v16, %v801_v43  ;;  %v1064_v33 = vmax.f32 %v1048_v45, 0.0  ;;  %v1987_v34 = vadd.f32 %v531_v0, %v1912_v62  ;;  %v937_v59 = vsub.f32 %v1973_v26, %v1981_v31 }
 0x206   :  { %v1080_v35 = vadd.f32 %v1064_v33, %v805_v29  ;;  %v938_v2 = vsub.f32 %v1984_v63, %v1987_v34 }
 0x208   :  { %v1293_v1 = vpack.c.bf16 %v1080_v35, %v1079_v53  ;;  %v535_v39 = vpop.f32.mrb[28].mxu1 }
 0x209   :  { %v1994_v27 = vadd.f32 %v535_v39, %v1908_v21  ;;  %v537_v40 = vpop.f32.mrb[29].mxu1 }
 0x20a   :  { %1309 = vst [vmem:[%s2038_s8 + $0x28] sm:$0xff] %v1293_v1   ;;  %v2000_v41 = vadd.f32 %v537_v40, %v1912_v62  ;;  %v539_v42 = vpop.f32.mrb[30].mxu1 }
 0x20b   :  { %v2003_v54 = vadd.f32 %v539_v42, %v1908_v21  ;;  %v541_v46 = vpop.f32.mrb[31].mxu1 }
 0x20c   :  { %v2006_v47 = vadd.f32 %v541_v46, %v1912_v62  ;;  %v939_v48 = vsub.f32 %v1994_v27, %v2000_v41 }
 0x20e   :  { %v940_v49 = vsub.f32 %v2003_v54, %v2006_v47 }
 0x210   :  { %v810_v50 = vpop.f32.mrb[32].mxu1 }
 0x211   :  { %v812_v52 = vpop.f32.mrb[33].mxu1  ;;  %v811_v38 = vadd.f32 %v810_v50, %v1820_v17 }
 0x212   :  { %v813_v55 = vadd.f32 %v812_v52, %v1846_v51  ;;  %v814_v19 = vpop.f32.mrb[34].mxu1 }
 0x213   :  { %v816_v56 = vpop.f32.mrb[35].mxu1  ;;  %v815_v15 = vadd.f32 %v814_v19, %v1820_v17 }
 0x214   :  { %v1229_v30 = vmul.f32 -1.442695, %v813_v55  ;;  %v817_v21 = vadd.f32 %v816_v56, %v1846_v51 }
 0x216   :  { %1491 = vpow2.f32 %v1229_v30  ;;  %v1230_v57 = vmul.f32 -1.442695, %v817_v21 }
 0x218   :  { %1493 = vpow2.f32 %v1230_v57  ;;  %v820_v62 = vpop.f32.mrb[36].mxu1 }
 0x219   :  { %v822_v60 = vpop.f32.mrb[37].mxu1 }
 0x21a   :  { %v823_v61 = vadd.f32 %v822_v60, %v1846_v51  ;;  %v824_v3 = vpop.f32.mrb[38].mxu1 }
 0x21b   :  { %v826_v4 = vpop.f32.mrb[39].mxu1 }
 0x21c   :  { %v1231_v5 = vmul.f32 -1.442695, %v823_v61  ;;  %v827_v6 = vadd.f32 %v826_v4, %v1846_v51 }
 0x21e   :  { %1495 = vpow2.f32 %v1231_v5  ;;  %v1232_v32 = vmul.f32 -1.442695, %v827_v6 }
 0x220   :  { %v1492_v25 = vpop.eup %1491  ;;  %1497 = vpow2.f32 %v1232_v32 }
 0x221   :  { %v889_v8 = vadd.f32 1.0, %v1492_v25 }
 0x222   :  { %v1494_v28 = vpop.eup %1493 }
 0x223   :  { %1499 = vrcp.f32 %v889_v8  ;;  %v890_v9 = vadd.f32 1.0, %v1494_v28 }
 0x225   :  { %1501 = vrcp.f32 %v890_v9 }
 0x228   :  { %v1496_v7 = vpop.eup %1495 }
 0x229   :  { %v891_v10 = vadd.f32 1.0, %v1496_v7 }
 0x22a   :  { %v1498_v37 = vpop.eup %1497 }
 0x22b   :  { %1503 = vrcp.f32 %v891_v10  ;;  %v892_v14 = vadd.f32 1.0, %v1498_v37 }
 0x22d   :  { %v1500_v11 = vpop.eup %1499  ;;  %1505 = vrcp.f32 %v892_v14 }
 0x22e   :  { %1003 = vperm.xlu0 %1377, %v1500_v11  }
 0x22f   :  { %v1502_v20 = vpop.eup %1501 }
 0x230   :  { %1008 = vperm.xlu1 %1378, %v1502_v20  }
 0x235   :  { %v1504_v51 = vpop.eup %1503 }
 0x236   :  { %1013 = vperm.xlu0 %1377, %v1504_v51  }
 0x237   :  { %v1506_v13 = vpop.eup %1505 }
 0x238   :  { %1018 = vperm.xlu1 %1378, %v1506_v13  }
 0x2ad   :  { %v1004_v12 = vpop.permute.xlu0 %1003 }
 0x2ae   :  { %v1033_v36 = vmul.f32 %v1004_v12, %v937_v59  ;;  %v825_v59 = vadd.f32 %v824_v3, %v1820_v17 }
 0x2af   :  { %v1009_v44 = vpop.permute.xlu1 %1008 }
 0x2b0   :  { %v1049_v18 = vadd.f32 %v1033_v36, %v1981_v31  ;;  %v1034_v43 = vmul.f32 %v1009_v44, %v938_v2  ;;  %v821_v31 = vadd.f32 %v820_v62, %v1820_v17 }
 0x2b2   :  { %v1065_v22 = vmax.f32 %v1049_v18, 0.0  ;;  %v1050_v23 = vadd.f32 %v1034_v43, %v1987_v34 }
 0x2b4   :  { %v1081_v26 = vadd.f32 %v1065_v22, %v811_v38  ;;  %v1066_v58 = vmax.f32 %v1050_v23, 0.0 }
 0x2b5   :  { %v1014_v29 = vpop.permute.xlu0 %1013 }
 0x2b6   :  { %v1082_v16 = vadd.f32 %v1066_v58, %v815_v15  ;;  %v1035_v45 = vmul.f32 %v1014_v29, %v939_v48 }
 0x2b7   :  { %v1019_v24 = vpop.permute.xlu1 %1018 }
 0x2b8   :  { %v1298_v63 = vpack.c.bf16 %v1082_v16, %v1081_v26  ;;  %v1051_v0 = vadd.f32 %v1035_v45, %v2000_v41  ;;  %v1036_v53 = vmul.f32 %v1019_v24, %v940_v49 }
 0x2ba   :  { %1310 = vst [vmem:[%s2038_s8 + $0x30] sm:$0xff] %v1298_v63   ;;  %v1067_v33 = vmax.f32 %v1051_v0, 0.0  ;;  %v1052_v34 = vadd.f32 %v1036_v53, %v2006_v47 }
 0x2bc   :  { %v1083_v35 = vadd.f32 %v1067_v33, %v821_v31  ;;  %v1068_v2 = vmax.f32 %v1052_v34, 0.0 }
 0x2be   :  { %v1084_v1 = vadd.f32 %v1068_v2, %v825_v59 }
 0x2c0   :  { %v1303_v39 = vpack.c.bf16 %v1084_v1, %v1083_v35 }
 0x2c2   :  { %1311 = vst [vmem:[%s2038_s8 + $0x38] sm:$0xff] %v1303_v39  }

</bundles_post_ra>
